<compile_context>
chip_gen: v6e
topology: v6e:2x2x1
jax: 0.10.0
libtpu: 0.0.40
codegen_flags: <defaults>
</compile_context>

<pallas_src>
import functools

import jax
import jax.numpy as jnp
from jax import lax
from jax.experimental import pallas as pl
from jax.experimental.pallas import tpu as pltpu


def _round_up(x, m):
    return (x + m - 1) // m * m


def _lstm_kernel(xw_ref,          # (T, BB, 4Hp)  compute-dtype: gather(Wx_all, token) + b_all
                 h0_ref, c0_ref,  # (BB, Hp)      f32 initial state
                 wh_ref,          # (Hp, 4Hp)     compute-dtype fused recurrent weights [f|i|o|c]
                 wy_ref,          # (Hp, Vp)      compute-dtype output projection weight
                 yb_ref,          # (1, Vp)       f32 output bias
                 y_ref,           # (T, BB, Vp)   f32 per-step logits (output)
                 hout_ref,        # (BB, Hp)      f32 final H (doubles as the time carry)
                 cout_ref,        # (BB, Hp)      f32 final C (doubles as the time carry)
                 hblk_ref,        # (T, BB, Hp)   compute-dtype scratch: this block's hidden states
                 *, seq_len, needs_mask):
    s = pl.program_id(1)                      # time-block index (sequential axis)
    T, BB, Hp = hblk_ref.shape
    Vp = y_ref.shape[-1]
    cdt = wh_ref.dtype

    @pl.when(s == 0)
    def _():
        hout_ref[...] = h0_ref[...]
        cout_ref[...] = c0_ref[...]

    def step(t, carry):
        H, C = carry
        # ONE fused-gate MXU matmul per step: (BB, Hp) @ (Hp, 4Hp), bf16
        # operands by default, f32 accumulate.  X-part + bias precomputed.
        g = xw_ref[t].astype(jnp.float32) + jnp.dot(
            H.astype(cdt), wh_ref[...], preferred_element_type=jnp.float32)
        # Gate order MUST match the wrapper concat order: [f, i, o, c].
        # Hp is a multiple of 128, so these lane slices are tile-aligned.
        f = jax.nn.sigmoid(g[:, 0 * Hp:1 * Hp])
        i = jax.nn.sigmoid(g[:, 1 * Hp:2 * Hp])
        o = jax.nn.sigmoid(g[:, 2 * Hp:3 * Hp])
        ct = jnp.tanh(g[:, 3 * Hp:4 * Hp])
        Cn = f * C + i * ct
        Hn = o * Cn                           # matches the reference: H = o * C (no tanh on C)
        if needs_mask:                        # freeze state on padded tail steps
            keep = ((s * T + t) < seq_len).astype(jnp.float32)
            Hn = H + keep * (Hn - H)
            Cn = C + keep * (Cn - C)
        hblk_ref[t] = Hn.astype(cdt)
        return Hn, Cn

    H, C = lax.fori_loop(0, T, step, (hout_ref[...], cout_ref[...]),
                         unroll=True)
    hout_ref[...] = H
    cout_ref[...] = C

    # Projection epilogue for the whole time block: one (T*BB, Hp) @ (Hp, Vp)
    # matmul (much bigger M than a per-step projection), no HBM round trip of
    # the hidden states.  Reshape is layout-free: BB % 8 == 0, Hp % 128 == 0.
    h_flat = hblk_ref[...].reshape(T * BB, Hp)
    y = jnp.dot(h_flat, wy_ref[...], preferred_element_type=jnp.float32)
    y = y + yb_ref[...]
    y_ref[...] = y.reshape(T, BB, Vp).astype(y_ref.dtype)


def lstm_forward(tokens, state, params, num_hiddens, num_vocabs,
                 *, time_block=32, batch_block=None,
                 compute_dtype=jnp.bfloat16):
    """tokens: (batch, seq) int32; state: (H0, C0) each (batch, num_hiddens) f32.

    Returns (Y, (H, C)) with Y: (seq, batch, num_vocabs) f32, matching the
    PyTorch module's forward.
    """
    H0, C0 = state
    B, S = tokens.shape
    V, Hd = num_vocabs, num_hiddens

    (f_wx, f_wh, f_b, i_wx, i_wh, i_b,
     c_wx, c_wh, c_b, o_wx, o_wh, o_b, y_wo, y_b) = params

    # Lane/sublane-aligned padded sizes.  Padded H lanes stay exactly zero
    # through the recurrence (zero wx/wh/bias pads => gates 0.5, c_tilde 0,
    # C_pad stays 0, H_pad = o*0 = 0) and zero Wy pad rows keep Y exact.
    Hp = _round_up(Hd, 128)
    Vp = _round_up(V, 128)
    Bp = _round_up(B, 8)
    T = max(1, min(time_block, S))
    Sp = _round_up(S, T)
    dh = Hp - Hd

    pad_cols = lambda w: jnp.pad(w, ((0, 0), (0, dh)))     # (V, Hd) -> (V, Hp)
    pad_sq = lambda w: jnp.pad(w, ((0, dh), (0, dh)))      # (Hd, Hd) -> (Hp, Hp)
    pad_vec = lambda b: jnp.pad(b, (0, dh))                # (Hd,) -> (Hp,)

    # Fuse the four gates; order [f, i, o, c] must match the kernel slicing.
    wx_all = jnp.concatenate(
        [pad_cols(f_wx), pad_cols(i_wx), pad_cols(o_wx), pad_cols(c_wx)], axis=1)  # (V, 4Hp)
    wh_all = jnp.concatenate(
        [pad_sq(f_wh), pad_sq(i_wh), pad_sq(o_wh), pad_sq(c_wh)], axis=1)          # (Hp, 4Hp)
    b_all = jnp.concatenate(
        [pad_vec(f_b), pad_vec(i_b), pad_vec(o_b), pad_vec(c_b)], axis=0)          # (4Hp,)

    # one_hot(tokens) @ Wx_all is a row gather: do it once, outside the
    # recurrence, fold the gate bias in, and stream it to the kernel in the
    # compute dtype (bf16 by default => ~half the HBM reads).
    xw = (wx_all[tokens.T] + b_all[None, None, :]).astype(compute_dtype)   # (S, B, 4Hp)
    xw = jnp.pad(xw, ((0, Sp - S), (0, Bp - B), (0, 0)))                   # (Sp, Bp, 4Hp)

    wh_all = wh_all.astype(compute_dtype)
    wy = jnp.pad(y_wo, ((0, dh), (0, Vp - V))).astype(compute_dtype)       # (Hp, Vp)
    yb = jnp.pad(y_b, (0, Vp - V)).reshape(1, Vp).astype(jnp.float32)      # (1, Vp)

    H0p = jnp.pad(H0.astype(jnp.float32), ((0, Bp - B), (0, dh)))          # (Bp, Hp)
    C0p = jnp.pad(C0.astype(jnp.float32), ((0, Bp - B), (0, dh)))

    # Batch block: single block by default (no overhead on 1-TC v5e/v6e).  Pass
    # a multiple of 8 that divides Bp to shard the 'parallel' batch axis across
    # v7x's two TensorCores.
    BB = Bp
    if batch_block is not None and batch_block % 8 == 0 and Bp % batch_block == 0:
        BB = batch_block

    grid = (Bp // BB, Sp // T)   # (parallel batch blocks, sequential time blocks)
    itemsize = jnp.dtype(compute_dtype).itemsize

    cost = pl.CostEstimate(
        flops=2 * Sp * Bp * Hp * (4 * Hp) + 2 * Sp * Bp * Hp * Vp,
        transcendentals=4 * Sp * Bp * Hp,
        bytes_accessed=(Sp * Bp * 4 * Hp * itemsize        # xw read
                        + Sp * Bp * Vp * 4                 # Y write
                        + Hp * 4 * Hp * itemsize           # Wh_all
                        + Hp * Vp * itemsize               # Wy
                        + 4 * Bp * Hp * 4))                # state in/out

    grid_spec = pltpu.PrefetchScalarGridSpec(
        num_scalar_prefetch=0,
        grid=grid,
        in_specs=[
            pl.BlockSpec((T, BB, 4 * Hp), lambda b, s: (s, b, 0)),   # xw block
            pl.BlockSpec((BB, Hp), lambda b, s: (b, 0)),             # H0
            pl.BlockSpec((BB, Hp), lambda b, s: (b, 0)),             # C0
            pl.BlockSpec((Hp, 4 * Hp), lambda b, s: (0, 0)),         # Wh_all (resident)
            pl.BlockSpec((Hp, Vp), lambda b, s: (0, 0)),             # Wy (resident)
            pl.BlockSpec((1, Vp), lambda b, s: (0, 0)),              # y bias
        ],
        out_specs=[
            pl.BlockSpec((T, BB, Vp), lambda b, s: (s, b, 0)),       # Y block
            pl.BlockSpec((BB, Hp), lambda b, s: (b, 0)),             # final H (carry)
            pl.BlockSpec((BB, Hp), lambda b, s: (b, 0)),             # final C (carry)
        ],
        scratch_shapes=[pltpu.VMEM((T, BB, Hp), compute_dtype)],     # per-block hidden states
    )

    kernel = functools.partial(_lstm_kernel, seq_len=S, needs_mask=(Sp != S))

    y_pad, h_fin, c_fin = pl.pallas_call(
        kernel,
        out_shape=(
            jax.ShapeDtypeStruct((Sp, Bp, Vp), jnp.float32),
            jax.ShapeDtypeStruct((Bp, Hp), jnp.float32),
            jax.ShapeDtypeStruct((Bp, Hp), jnp.float32),
        ),
        grid_spec=grid_spec,
        compiler_params=pltpu.CompilerParams(
            dimension_semantics=("parallel", "arbitrary"),
            vmem_limit_bytes=64 * 1024 * 1024),
        cost_estimate=cost,
    )(xw, H0p, C0p, wh_all, wy, yb)

    y = y_pad[:S, :B, :V]
    return y, (h_fin[:B, :Hd], c_fin[:B, :Hd])


def init_params(key, num_hiddens, num_vocabs):
    """Deterministic init matching the PyTorch module's shapes (randn * 0.01, zero biases)."""
    ks = jax.random.split(key, 9)
    V, H = num_vocabs, num_hiddens

    def gate(k1, k2):
        wx = jax.random.normal(k1, (V, H), jnp.float32) * 0.01
        wh = jax.random.normal(k2, (H, H), jnp.float32) * 0.01
        b = jnp.zeros((H,), jnp.float32)
        return wx, wh, b

    f_wx, f_wh, f_b = gate(ks[0], ks[1])
    i_wx, i_wh, i_b = gate(ks[2], ks[3])
    c_wx, c_wh, c_b = gate(ks[4], ks[5])
    o_wx, o_wh, o_b = gate(ks[6], ks[7])
    y_wo = jax.random.normal(ks[8], (H, V), jnp.float32) * 0.01
    y_b = jnp.zeros((V,), jnp.float32)
    return (f_wx, f_wh, f_b, i_wx, i_wh, i_b,
            c_wx, c_wh, c_b, o_wx, o_wh, o_b, y_wo, y_b)


def lstm_forward_ref(tokens, state, params):
    """Pure-JAX reference mirroring the PyTorch loop (un-fused), for correctness checks."""
    (f_wx, f_wh, f_b, i_wx, i_wh, i_b,
     c_wx, c_wh, c_b, o_wx, o_wh, o_b, y_wo, y_b) = params
    V = f_wx.shape[0]
    X_all = jax.nn.one_hot(tokens.T, V, dtype=jnp.float32)
    H, C = state
    outs = []
    for t in range(X_all.shape[0]):
        X = X_all[t]
        f = jax.nn.sigmoid(X @ f_wx + H @ f_wh + f_b)
        i = jax.nn.sigmoid(X @ i_wx + H @ i_wh + i_b)
        o = jax.nn.sigmoid(X @ o_wx + H @ o_wh + o_b)
        ct = jnp.tanh(X @ c_wx + H @ c_wh + c_b)
        C = f * C + i * ct
        H = o * C
        outs.append(H @ y_wo + y_b)
    return jnp.stack(outs, axis=0), (H, C)


# TODO(synk): weight_clip / init_state are training-time utilities on the PyTorch
# module (gradient clipping, zero-state construction); not part of the forward pass.

if __name__ == "__main__":
    key = jax.random.PRNGKey(0)

    def run_case(num_hiddens, num_vocabs, batch, seq, time_block,
                 compute_dtype, atol, rtol):
        kp, kt, kh, kc = jax.random.split(jax.random.fold_in(key, num_hiddens + seq), 4)
        params = init_params(kp, num_hiddens, num_vocabs)
        tokens = jax.random.randint(kt, (batch, seq), 0, num_vocabs, dtype=jnp.int32)
        state0 = (jax.random.normal(kh, (batch, num_hiddens), jnp.float32) * 0.1,
                  jax.random.normal(kc, (batch, num_hiddens), jnp.float32) * 0.1)

        fwd = jax.jit(functools.partial(
            lstm_forward, num_hiddens=num_hiddens, num_vocabs=num_vocabs,
            time_block=time_block, compute_dtype=compute_dtype))
        y, (h_fin, c_fin) = fwd(tokens, state0, params)
        jax.block_until_ready((y, h_fin, c_fin))

        y_ref, (h_ref, c_ref) = lstm_forward_ref(tokens, state0, params)
        assert y.shape == y_ref.shape
        assert jnp.allclose(y, y_ref, atol=atol, rtol=rtol)
        assert jnp.allclose(h_fin, h_ref, atol=atol, rtol=rtol)
        assert jnp.allclose(c_fin, c_ref, atol=atol, rtol=rtol)

    # 1) Aligned shapes, exact f32 math path (tight tolerance).
    run_case(num_hiddens=128, num_vocabs=128, batch=8, seq=16, time_block=8,
             compute_dtype=jnp.float32, atol=1e-5, rtol=1e-4)

    # 2) Unaligned shapes: exercises H/V lane padding, batch padding and the
    #    time-tail mask (still exact f32 math, tight tolerance).
    run_case(num_hiddens=96, num_vocabs=112, batch=6, seq=13, time_block=8,
             compute_dtype=jnp.float32, atol=1e-5, rtol=1e-4)

    # 3) Default fast path: bf16 operands for the recurrence / projection
    #    matmuls and bf16 xw stream (looser tolerance).
    run_case(num_hiddens=128, num_vocabs=128, batch=8, seq=16, time_block=32,
             compute_dtype=jnp.bfloat16, atol=5e-3, rtol=5e-2)

    print("KERNEL_OK")
</pallas_src>

<mosaic_0001>
module attributes {stable_mosaic.version = 11 : i64} {
  func.func @_lstm_kernel(%arg0: i32, %arg1: i32, %arg2: memref<8x8x512xf32, #tpu.memory_space<vmem>>, %arg3: memref<8x128xf32, #tpu.memory_space<vmem>>, %arg4: memref<8x128xf32, #tpu.memory_space<vmem>>, %arg5: memref<128x512xf32, #tpu.memory_space<vmem>>, %arg6: memref<128x128xf32, #tpu.memory_space<vmem>>, %arg7: memref<1x128xf32, #tpu.memory_space<vmem>>, %arg8: memref<8x8x128xf32, #tpu.memory_space<vmem>>, %arg9: memref<8x128xf32, #tpu.memory_space<vmem>>, %arg10: memref<8x128xf32, #tpu.memory_space<vmem>>, %arg11: memref<8x8x128xf32, #tpu.memory_space<vmem>>) attributes {dimension_semantics = [#tpu.dimension_semantics<parallel>, #tpu.dimension_semantics<arbitrary>], iteration_bounds = array<i64: 1, 2>, scalar_prefetch = 0 : i64, scratch_operands = 1 : i64, tpu.core_type = #tpu.core_type<tc>, window_params = [{transform_indices = @transform_0, window_bounds = array<i64: 8, 8, 512>}, {transform_indices = @transform_1, window_bounds = array<i64: 8, 128>}, {transform_indices = @transform_2, window_bounds = array<i64: 8, 128>}, {pipeline_mode = #tpu.pipeline_mode<synchronous>, transform_indices = @transform_3, window_bounds = array<i64: 128, 512>}, {pipeline_mode = #tpu.pipeline_mode<synchronous>, transform_indices = @transform_4, window_bounds = array<i64: 128, 128>}, {pipeline_mode = #tpu.pipeline_mode<synchronous>, transform_indices = @transform_5, window_bounds = array<i64: 1, 128>}, {transform_indices = @transform_6, window_bounds = array<i64: 8, 8, 128>}, {transform_indices = @transform_7, window_bounds = array<i64: 8, 128>}, {transform_indices = @transform_8, window_bounds = array<i64: 8, 128>}]} {
    %c0_i32 = arith.constant 0 : i32
    %0 = arith.cmpi eq, %arg1, %c0_i32 : i32
    %1 = arith.extui %0 : i1 to i32
    %c0_i32_0 = arith.constant 0 : i32
    %2 = arith.cmpi ne, %1, %c0_i32_0 : i32
    scf.if %2 {
      %c0_99 = arith.constant 0 : index
      %c0_100 = arith.constant 0 : index
      %288 = vector.load %arg3[%c0_99, %c0_100] : memref<8x128xf32, #tpu.memory_space<vmem>>, vector<8x128xf32>
      %c0_101 = arith.constant 0 : index
      %c0_102 = arith.constant 0 : index
      %289 = vector.load %arg9[%c0_101, %c0_102] : memref<8x128xf32, #tpu.memory_space<vmem>>, vector<8x128xf32>
      tpu.vector_store %arg9[%c0_101, %c0_102], %288 {strides = array<i32>} : memref<8x128xf32, #tpu.memory_space<vmem>>, vector<8x128xf32>,
      %c0_103 = arith.constant 0 : index
      %c0_104 = arith.constant 0 : index
      %290 = vector.load %arg4[%c0_103, %c0_104] : memref<8x128xf32, #tpu.memory_space<vmem>>, vector<8x128xf32>
      %c0_105 = arith.constant 0 : index
      %c0_106 = arith.constant 0 : index
      %291 = vector.load %arg10[%c0_105, %c0_106] : memref<8x128xf32, #tpu.memory_space<vmem>>, vector<8x128xf32>
      tpu.vector_store %arg10[%c0_105, %c0_106], %290 {strides = array<i32>} : memref<8x128xf32, #tpu.memory_space<vmem>>, vector<8x128xf32>,
    } else {
    }
    %c0 = arith.constant 0 : index
    %c0_1 = arith.constant 0 : index
    %3 = vector.load %arg9[%c0, %c0_1] : memref<8x128xf32, #tpu.memory_space<vmem>>, vector<8x128xf32>
    %c0_2 = arith.constant 0 : index
    %c0_3 = arith.constant 0 : index
    %4 = vector.load %arg10[%c0_2, %c0_3] : memref<8x128xf32, #tpu.memory_space<vmem>>, vector<8x128xf32>
    %c0_i32_4 = arith.constant 0 : i32
    %5 = arith.index_cast %c0_i32_4 : i32 to index
    %c0_5 = arith.constant 0 : index
    %c0_6 = arith.constant 0 : index
    %6 = vector.load %arg2[%5, %c0_5, %c0_6] : memref<8x8x512xf32, #tpu.memory_space<vmem>>, vector<1x8x512xf32>
    %7 = vector.shape_cast %6 : vector<1x8x512xf32> to vector<8x512xf32>
    %c0_7 = arith.constant 0 : index
    %c0_8 = arith.constant 0 : index
    %8 = vector.load %arg5[%c0_7, %c0_8] : memref<128x512xf32, #tpu.memory_space<vmem>>, vector<128x512xf32>
    %cst = arith.constant dense<0.000000e+00> : vector<8x512xf32>
    %9 = tpu.matmul %3, %8, %cst {dimension_numbers = #tpu.dot_dimension_numbers<[1], [0], [0], [1], [0, 0, 1, 1], [], []>} : vector<8x128xf32>, vector<128x512xf32>, vector<8x512xf32> -> vector<8x512xf32>
    %10 = arith.addf %7, %9 : vector<8x512xf32>
    %11 = vector.extract_strided_slice %10 {offsets = [0, 0], sizes = [8, 128], strides = [1, 1]} : vector<8x512xf32> to vector<8x128xf32>
    %12 = arith.negf %11 : vector<8x128xf32>
    %13 = math.exp %12 : vector<8x128xf32>
    %cst_9 = arith.constant 1.000000e+00 : f32
    %14 = vector.broadcast %cst_9 : f32 to vector<8x128xf32>
    %15 = arith.addf %14, %13 : vector<8x128xf32>
    %16 = arith.divf %14, %15 : vector<8x128xf32>
    %17 = vector.extract_strided_slice %10 {offsets = [0, 128], sizes = [8, 128], strides = [1, 1]} : vector<8x512xf32> to vector<8x128xf32>
    %18 = arith.negf %17 : vector<8x128xf32>
    %19 = math.exp %18 : vector<8x128xf32>
    %cst_10 = arith.constant 1.000000e+00 : f32
    %20 = vector.broadcast %cst_10 : f32 to vector<8x128xf32>
    %21 = arith.addf %20, %19 : vector<8x128xf32>
    %22 = arith.divf %20, %21 : vector<8x128xf32>
    %23 = vector.extract_strided_slice %10 {offsets = [0, 256], sizes = [8, 128], strides = [1, 1]} : vector<8x512xf32> to vector<8x128xf32>
    %24 = arith.negf %23 : vector<8x128xf32>
    %25 = math.exp %24 : vector<8x128xf32>
    %cst_11 = arith.constant 1.000000e+00 : f32
    %26 = vector.broadcast %cst_11 : f32 to vector<8x128xf32>
    %27 = arith.addf %26, %25 : vector<8x128xf32>
    %28 = arith.divf %26, %27 : vector<8x128xf32>
    %29 = vector.extract_strided_slice %10 {offsets = [0, 384], sizes = [8, 128], strides = [1, 1]} : vector<8x512xf32> to vector<8x128xf32>
    %30 = math.tanh %29 : vector<8x128xf32>
    %31 = arith.mulf %16, %4 : vector<8x128xf32>
    %32 = arith.mulf %22, %30 : vector<8x128xf32>
    %33 = arith.addf %31, %32 : vector<8x128xf32>
    %34 = arith.mulf %28, %33 : vector<8x128xf32>
    %35 = arith.index_cast %c0_i32_4 : i32 to index
    %c0_12 = arith.constant 0 : index
    %c0_13 = arith.constant 0 : index
    %36 = vector.load %arg11[%35, %c0_12, %c0_13] : memref<8x8x128xf32, #tpu.memory_space<vmem>>, vector<1x8x128xf32>
    %37 = vector.shape_cast %36 : vector<1x8x128xf32> to vector<8x128xf32>
    %38 = vector.shape_cast %34 : vector<8x128xf32> to vector<1x8x128xf32>
    tpu.vector_store %arg11[%35, %c0_12, %c0_13], %38 {strides = array<i32>} : memref<8x8x128xf32, #tpu.memory_space<vmem>>, vector<1x8x128xf32>,
    %c1_i32 = arith.constant 1 : i32
    %39 = arith.index_cast %c1_i32 : i32 to index
    %c0_14 = arith.constant 0 : index
    %c0_15 = arith.constant 0 : index
    %40 = vector.load %arg2[%39, %c0_14, %c0_15] : memref<8x8x512xf32, #tpu.memory_space<vmem>>, vector<1x8x512xf32>
    %41 = vector.shape_cast %40 : vector<1x8x512xf32> to vector<8x512xf32>
    %c0_16 = arith.constant 0 : index
    %c0_17 = arith.constant 0 : index
    %42 = vector.load %arg5[%c0_16, %c0_17] : memref<128x512xf32, #tpu.memory_space<vmem>>, vector<128x512xf32>
    %cst_18 = arith.constant dense<0.000000e+00> : vector<8x512xf32>
    %43 = tpu.matmul %34, %42, %cst_18 {dimension_numbers = #tpu.dot_dimension_numbers<[1], [0], [0], [1], [0, 0, 1, 1], [], []>} : vector<8x128xf32>, vector<128x512xf32>, vector<8x512xf32> -> vector<8x512xf32>
    %44 = arith.addf %41, %43 : vector<8x512xf32>
    %45 = vector.extract_strided_slice %44 {offsets = [0, 0], sizes = [8, 128], strides = [1, 1]} : vector<8x512xf32> to vector<8x128xf32>
    %46 = arith.negf %45 : vector<8x128xf32>
    %47 = math.exp %46 : vector<8x128xf32>
    %cst_19 = arith.constant 1.000000e+00 : f32
    %48 = vector.broadcast %cst_19 : f32 to vector<8x128xf32>
    %49 = arith.addf %48, %47 : vector<8x128xf32>
    %50 = arith.divf %48, %49 : vector<8x128xf32>
    %51 = vector.extract_strided_slice %44 {offsets = [0, 128], sizes = [8, 128], strides = [1, 1]} : vector<8x512xf32> to vector<8x128xf32>
    %52 = arith.negf %51 : vector<8x128xf32>
    %53 = math.exp %52 : vector<8x128xf32>
    %cst_20 = arith.constant 1.000000e+00 : f32
    %54 = vector.broadcast %cst_20 : f32 to vector<8x128xf32>
    %55 = arith.addf %54, %53 : vector<8x128xf32>
    %56 = arith.divf %54, %55 : vector<8x128xf32>
    %57 = vector.extract_strided_slice %44 {offsets = [0, 256], sizes = [8, 128], strides = [1, 1]} : vector<8x512xf32> to vector<8x128xf32>
    %58 = arith.negf %57 : vector<8x128xf32>
    %59 = math.exp %58 : vector<8x128xf32>
    %cst_21 = arith.constant 1.000000e+00 : f32
    %60 = vector.broadcast %cst_21 : f32 to vector<8x128xf32>
    %61 = arith.addf %60, %59 : vector<8x128xf32>
    %62 = arith.divf %60, %61 : vector<8x128xf32>
    %63 = vector.extract_strided_slice %44 {offsets = [0, 384], sizes = [8, 128], strides = [1, 1]} : vector<8x512xf32> to vector<8x128xf32>
    %64 = math.tanh %63 : vector<8x128xf32>
    %65 = arith.mulf %50, %33 : vector<8x128xf32>
    %66 = arith.mulf %56, %64 : vector<8x128xf32>
    %67 = arith.addf %65, %66 : vector<8x128xf32>
    %68 = arith.mulf %62, %67 : vector<8x128xf32>
    %69 = arith.index_cast %c1_i32 : i32 to index
    %c0_22 = arith.constant 0 : index
    %c0_23 = arith.constant 0 : index
    %70 = vector.load %arg11[%69, %c0_22, %c0_23] : memref<8x8x128xf32, #tpu.memory_space<vmem>>, vector<1x8x128xf32>
    %71 = vector.shape_cast %70 : vector<1x8x128xf32> to vector<8x128xf32>
    %72 = vector.shape_cast %68 : vector<8x128xf32> to vector<1x8x128xf32>
    tpu.vector_store %arg11[%69, %c0_22, %c0_23], %72 {strides = array<i32>} : memref<8x8x128xf32, #tpu.memory_space<vmem>>, vector<1x8x128xf32>,
    %c2_i32 = arith.constant 2 : i32
    %73 = arith.index_cast %c2_i32 : i32 to index
    %c0_24 = arith.constant 0 : index
    %c0_25 = arith.constant 0 : index
    %74 = vector.load %arg2[%73, %c0_24, %c0_25] : memref<8x8x512xf32, #tpu.memory_space<vmem>>, vector<1x8x512xf32>
    %75 = vector.shape_cast %74 : vector<1x8x512xf32> to vector<8x512xf32>
    %c0_26 = arith.constant 0 : index
    %c0_27 = arith.constant 0 : index
    %76 = vector.load %arg5[%c0_26, %c0_27] : memref<128x512xf32, #tpu.memory_space<vmem>>, vector<128x512xf32>
    %cst_28 = arith.constant dense<0.000000e+00> : vector<8x512xf32>
    %77 = tpu.matmul %68, %76, %cst_28 {dimension_numbers = #tpu.dot_dimension_numbers<[1], [0], [0], [1], [0, 0, 1, 1], [], []>} : vector<8x128xf32>, vector<128x512xf32>, vector<8x512xf32> -> vector<8x512xf32>
    %78 = arith.addf %75, %77 : vector<8x512xf32>
    %79 = vector.extract_strided_slice %78 {offsets = [0, 0], sizes = [8, 128], strides = [1, 1]} : vector<8x512xf32> to vector<8x128xf32>
    %80 = arith.negf %79 : vector<8x128xf32>
    %81 = math.exp %80 : vector<8x128xf32>
    %cst_29 = arith.constant 1.000000e+00 : f32
    %82 = vector.broadcast %cst_29 : f32 to vector<8x128xf32>
    %83 = arith.addf %82, %81 : vector<8x128xf32>
    %84 = arith.divf %82, %83 : vector<8x128xf32>
    %85 = vector.extract_strided_slice %78 {offsets = [0, 128], sizes = [8, 128], strides = [1, 1]} : vector<8x512xf32> to vector<8x128xf32>
    %86 = arith.negf %85 : vector<8x128xf32>
    %87 = math.exp %86 : vector<8x128xf32>
    %cst_30 = arith.constant 1.000000e+00 : f32
    %88 = vector.broadcast %cst_30 : f32 to vector<8x128xf32>
    %89 = arith.addf %88, %87 : vector<8x128xf32>
    %90 = arith.divf %88, %89 : vector<8x128xf32>
    %91 = vector.extract_strided_slice %78 {offsets = [0, 256], sizes = [8, 128], strides = [1, 1]} : vector<8x512xf32> to vector<8x128xf32>
    %92 = arith.negf %91 : vector<8x128xf32>
    %93 = math.exp %92 : vector<8x128xf32>
    %cst_31 = arith.constant 1.000000e+00 : f32
    %94 = vector.broadcast %cst_31 : f32 to vector<8x128xf32>
    %95 = arith.addf %94, %93 : vector<8x128xf32>
    %96 = arith.divf %94, %95 : vector<8x128xf32>
    %97 = vector.extract_strided_slice %78 {offsets = [0, 384], sizes = [8, 128], strides = [1, 1]} : vector<8x512xf32> to vector<8x128xf32>
    %98 = math.tanh %97 : vector<8x128xf32>
    %99 = arith.mulf %84, %67 : vector<8x128xf32>
    %100 = arith.mulf %90, %98 : vector<8x128xf32>
    %101 = arith.addf %99, %100 : vector<8x128xf32>
    %102 = arith.mulf %96, %101 : vector<8x128xf32>
    %103 = arith.index_cast %c2_i32 : i32 to index
    %c0_32 = arith.constant 0 : index
    %c0_33 = arith.constant 0 : index
    %104 = vector.load %arg11[%103, %c0_32, %c0_33] : memref<8x8x128xf32, #tpu.memory_space<vmem>>, vector<1x8x128xf32>
    %105 = vector.shape_cast %104 : vector<1x8x128xf32> to vector<8x128xf32>
    %106 = vector.shape_cast %102 : vector<8x128xf32> to vector<1x8x128xf32>
    tpu.vector_store %arg11[%103, %c0_32, %c0_33], %106 {strides = array<i32>} : memref<8x8x128xf32, #tpu.memory_space<vmem>>, vector<1x8x128xf32>,
    %c3_i32 = arith.constant 3 : i32
    %107 = arith.index_cast %c3_i32 : i32 to index
    %c0_34 = arith.constant 0 : index
    %c0_35 = arith.constant 0 : index
    %108 = vector.load %arg2[%107, %c0_34, %c0_35] : memref<8x8x512xf32, #tpu.memory_space<vmem>>, vector<1x8x512xf32>
    %109 = vector.shape_cast %108 : vector<1x8x512xf32> to vector<8x512xf32>
    %c0_36 = arith.constant 0 : index
    %c0_37 = arith.constant 0 : index
    %110 = vector.load %arg5[%c0_36, %c0_37] : memref<128x512xf32, #tpu.memory_space<vmem>>, vector<128x512xf32>
    %cst_38 = arith.constant dense<0.000000e+00> : vector<8x512xf32>
    %111 = tpu.matmul %102, %110, %cst_38 {dimension_numbers = #tpu.dot_dimension_numbers<[1], [0], [0], [1], [0, 0, 1, 1], [], []>} : vector<8x128xf32>, vector<128x512xf32>, vector<8x512xf32> -> vector<8x512xf32>
    %112 = arith.addf %109, %111 : vector<8x512xf32>
    %113 = vector.extract_strided_slice %112 {offsets = [0, 0], sizes = [8, 128], strides = [1, 1]} : vector<8x512xf32> to vector<8x128xf32>
    %114 = arith.negf %113 : vector<8x128xf32>
    %115 = math.exp %114 : vector<8x128xf32>
    %cst_39 = arith.constant 1.000000e+00 : f32
    %116 = vector.broadcast %cst_39 : f32 to vector<8x128xf32>
    %117 = arith.addf %116, %115 : vector<8x128xf32>
    %118 = arith.divf %116, %117 : vector<8x128xf32>
    %119 = vector.extract_strided_slice %112 {offsets = [0, 128], sizes = [8, 128], strides = [1, 1]} : vector<8x512xf32> to vector<8x128xf32>
    %120 = arith.negf %119 : vector<8x128xf32>
    %121 = math.exp %120 : vector<8x128xf32>
    %cst_40 = arith.constant 1.000000e+00 : f32
    %122 = vector.broadcast %cst_40 : f32 to vector<8x128xf32>
    %123 = arith.addf %122, %121 : vector<8x128xf32>
    %124 = arith.divf %122, %123 : vector<8x128xf32>
    %125 = vector.extract_strided_slice %112 {offsets = [0, 256], sizes = [8, 128], strides = [1, 1]} : vector<8x512xf32> to vector<8x128xf32>
    %126 = arith.negf %125 : vector<8x128xf32>
    %127 = math.exp %126 : vector<8x128xf32>
    %cst_41 = arith.constant 1.000000e+00 : f32
    %128 = vector.broadcast %cst_41 : f32 to vector<8x128xf32>
    %129 = arith.addf %128, %127 : vector<8x128xf32>
    %130 = arith.divf %128, %129 : vector<8x128xf32>
    %131 = vector.extract_strided_slice %112 {offsets = [0, 384], sizes = [8, 128], strides = [1, 1]} : vector<8x512xf32> to vector<8x128xf32>
    %132 = math.tanh %131 : vector<8x128xf32>
    %133 = arith.mulf %118, %101 : vector<8x128xf32>
    %134 = arith.mulf %124, %132 : vector<8x128xf32>
    %135 = arith.addf %133, %134 : vector<8x128xf32>
    %136 = arith.mulf %130, %135 : vector<8x128xf32>
    %137 = arith.index_cast %c3_i32 : i32 to index
    %c0_42 = arith.constant 0 : index
    %c0_43 = arith.constant 0 : index
    %138 = vector.load %arg11[%137, %c0_42, %c0_43] : memref<8x8x128xf32, #tpu.memory_space<vmem>>, vector<1x8x128xf32>
    %139 = vector.shape_cast %138 : vector<1x8x128xf32> to vector<8x128xf32>
    %140 = vector.shape_cast %136 : vector<8x128xf32> to vector<1x8x128xf32>
    tpu.vector_store %arg11[%137, %c0_42, %c0_43], %140 {strides = array<i32>} : memref<8x8x128xf32, #tpu.memory_space<vmem>>, vector<1x8x128xf32>,
    %c4_i32 = arith.constant 4 : i32
    %141 = arith.index_cast %c4_i32 : i32 to index
    %c0_44 = arith.constant 0 : index
    %c0_45 = arith.constant 0 : index
    %142 = vector.load %arg2[%141, %c0_44, %c0_45] : memref<8x8x512xf32, #tpu.memory_space<vmem>>, vector<1x8x512xf32>
    %143 = vector.shape_cast %142 : vector<1x8x512xf32> to vector<8x512xf32>
    %c0_46 = arith.constant 0 : index
    %c0_47 = arith.constant 0 : index
    %144 = vector.load %arg5[%c0_46, %c0_47] : memref<128x512xf32, #tpu.memory_space<vmem>>, vector<128x512xf32>
    %cst_48 = arith.constant dense<0.000000e+00> : vector<8x512xf32>
    %145 = tpu.matmul %136, %144, %cst_48 {dimension_numbers = #tpu.dot_dimension_numbers<[1], [0], [0], [1], [0, 0, 1, 1], [], []>} : vector<8x128xf32>, vector<128x512xf32>, vector<8x512xf32> -> vector<8x512xf32>
    %146 = arith.addf %143, %145 : vector<8x512xf32>
    %147 = vector.extract_strided_slice %146 {offsets = [0, 0], sizes = [8, 128], strides = [1, 1]} : vector<8x512xf32> to vector<8x128xf32>
    %148 = arith.negf %147 : vector<8x128xf32>
    %149 = math.exp %148 : vector<8x128xf32>
    %cst_49 = arith.constant 1.000000e+00 : f32
    %150 = vector.broadcast %cst_49 : f32 to vector<8x128xf32>
    %151 = arith.addf %150, %149 : vector<8x128xf32>
    %152 = arith.divf %150, %151 : vector<8x128xf32>
    %153 = vector.extract_strided_slice %146 {offsets = [0, 128], sizes = [8, 128], strides = [1, 1]} : vector<8x512xf32> to vector<8x128xf32>
    %154 = arith.negf %153 : vector<8x128xf32>
    %155 = math.exp %154 : vector<8x128xf32>
    %cst_50 = arith.constant 1.000000e+00 : f32
    %156 = vector.broadcast %cst_50 : f32 to vector<8x128xf32>
    %157 = arith.addf %156, %155 : vector<8x128xf32>
    %158 = arith.divf %156, %157 : vector<8x128xf32>
    %159 = vector.extract_strided_slice %146 {offsets = [0, 256], sizes = [8, 128], strides = [1, 1]} : vector<8x512xf32> to vector<8x128xf32>
    %160 = arith.negf %159 : vector<8x128xf32>
    %161 = math.exp %160 : vector<8x128xf32>
    %cst_51 = arith.constant 1.000000e+00 : f32
    %162 = vector.broadcast %cst_51 : f32 to vector<8x128xf32>
    %163 = arith.addf %162, %161 : vector<8x128xf32>
    %164 = arith.divf %162, %163 : vector<8x128xf32>
    %165 = vector.extract_strided_slice %146 {offsets = [0, 384], sizes = [8, 128], strides = [1, 1]} : vector<8x512xf32> to vector<8x128xf32>
    %166 = math.tanh %165 : vector<8x128xf32>
    %167 = arith.mulf %152, %135 : vector<8x128xf32>
    %168 = arith.mulf %158, %166 : vector<8x128xf32>
    %169 = arith.addf %167, %168 : vector<8x128xf32>
    %170 = arith.mulf %164, %169 : vector<8x128xf32>
    %171 = arith.index_cast %c4_i32 : i32 to index
    %c0_52 = arith.constant 0 : index
    %c0_53 = arith.constant 0 : index
    %172 = vector.load %arg11[%171, %c0_52, %c0_53] : memref<8x8x128xf32, #tpu.memory_space<vmem>>, vector<1x8x128xf32>
    %173 = vector.shape_cast %172 : vector<1x8x128xf32> to vector<8x128xf32>
    %174 = vector.shape_cast %170 : vector<8x128xf32> to vector<1x8x128xf32>
    tpu.vector_store %arg11[%171, %c0_52, %c0_53], %174 {strides = array<i32>} : memref<8x8x128xf32, #tpu.memory_space<vmem>>, vector<1x8x128xf32>,
    %c5_i32 = arith.constant 5 : i32
    %175 = arith.index_cast %c5_i32 : i32 to index
    %c0_54 = arith.constant 0 : index
    %c0_55 = arith.constant 0 : index
    %176 = vector.load %arg2[%175, %c0_54, %c0_55] : memref<8x8x512xf32, #tpu.memory_space<vmem>>, vector<1x8x512xf32>
    %177 = vector.shape_cast %176 : vector<1x8x512xf32> to vector<8x512xf32>
    %c0_56 = arith.constant 0 : index
    %c0_57 = arith.constant 0 : index
    %178 = vector.load %arg5[%c0_56, %c0_57] : memref<128x512xf32, #tpu.memory_space<vmem>>, vector<128x512xf32>
    %cst_58 = arith.constant dense<0.000000e+00> : vector<8x512xf32>
    %179 = tpu.matmul %170, %178, %cst_58 {dimension_numbers = #tpu.dot_dimension_numbers<[1], [0], [0], [1], [0, 0, 1, 1], [], []>} : vector<8x128xf32>, vector<128x512xf32>, vector<8x512xf32> -> vector<8x512xf32>
    %180 = arith.addf %177, %179 : vector<8x512xf32>
    %181 = vector.extract_strided_slice %180 {offsets = [0, 0], sizes = [8, 128], strides = [1, 1]} : vector<8x512xf32> to vector<8x128xf32>
    %182 = arith.negf %181 : vector<8x128xf32>
    %183 = math.exp %182 : vector<8x128xf32>
    %cst_59 = arith.constant 1.000000e+00 : f32
    %184 = vector.broadcast %cst_59 : f32 to vector<8x128xf32>
    %185 = arith.addf %184, %183 : vector<8x128xf32>
    %186 = arith.divf %184, %185 : vector<8x128xf32>
    %187 = vector.extract_strided_slice %180 {offsets = [0, 128], sizes = [8, 128], strides = [1, 1]} : vector<8x512xf32> to vector<8x128xf32>
    %188 = arith.negf %187 : vector<8x128xf32>
    %189 = math.exp %188 : vector<8x128xf32>
    %cst_60 = arith.constant 1.000000e+00 : f32
    %190 = vector.broadcast %cst_60 : f32 to vector<8x128xf32>
    %191 = arith.addf %190, %189 : vector<8x128xf32>
    %192 = arith.divf %190, %191 : vector<8x128xf32>
    %193 = vector.extract_strided_slice %180 {offsets = [0, 256], sizes = [8, 128], strides = [1, 1]} : vector<8x512xf32> to vector<8x128xf32>
    %194 = arith.negf %193 : vector<8x128xf32>
    %195 = math.exp %194 : vector<8x128xf32>
    %cst_61 = arith.constant 1.000000e+00 : f32
    %196 = vector.broadcast %cst_61 : f32 to vector<8x128xf32>
    %197 = arith.addf %196, %195 : vector<8x128xf32>
    %198 = arith.divf %196, %197 : vector<8x128xf32>
    %199 = vector.extract_strided_slice %180 {offsets = [0, 384], sizes = [8, 128], strides = [1, 1]} : vector<8x512xf32> to vector<8x128xf32>
    %200 = math.tanh %199 : vector<8x128xf32>
    %201 = arith.mulf %186, %169 : vector<8x128xf32>
    %202 = arith.mulf %192, %200 : vector<8x128xf32>
    %203 = arith.addf %201, %202 : vector<8x128xf32>
    %204 = arith.mulf %198, %203 : vector<8x128xf32>
    %205 = arith.index_cast %c5_i32 : i32 to index
    %c0_62 = arith.constant 0 : index
    %c0_63 = arith.constant 0 : index
    %206 = vector.load %arg11[%205, %c0_62, %c0_63] : memref<8x8x128xf32, #tpu.memory_space<vmem>>, vector<1x8x128xf32>
    %207 = vector.shape_cast %206 : vector<1x8x128xf32> to vector<8x128xf32>
    %208 = vector.shape_cast %204 : vector<8x128xf32> to vector<1x8x128xf32>
    tpu.vector_store %arg11[%205, %c0_62, %c0_63], %208 {strides = array<i32>} : memref<8x8x128xf32, #tpu.memory_space<vmem>>, vector<1x8x128xf32>,
    %c6_i32 = arith.constant 6 : i32
    %209 = arith.index_cast %c6_i32 : i32 to index
    %c0_64 = arith.constant 0 : index
    %c0_65 = arith.constant 0 : index
    %210 = vector.load %arg2[%209, %c0_64, %c0_65] : memref<8x8x512xf32, #tpu.memory_space<vmem>>, vector<1x8x512xf32>
    %211 = vector.shape_cast %210 : vector<1x8x512xf32> to vector<8x512xf32>
    %c0_66 = arith.constant 0 : index
    %c0_67 = arith.constant 0 : index
    %212 = vector.load %arg5[%c0_66, %c0_67] : memref<128x512xf32, #tpu.memory_space<vmem>>, vector<128x512xf32>
    %cst_68 = arith.constant dense<0.000000e+00> : vector<8x512xf32>
    %213 = tpu.matmul %204, %212, %cst_68 {dimension_numbers = #tpu.dot_dimension_numbers<[1], [0], [0], [1], [0, 0, 1, 1], [], []>} : vector<8x128xf32>, vector<128x512xf32>, vector<8x512xf32> -> vector<8x512xf32>
    %214 = arith.addf %211, %213 : vector<8x512xf32>
    %215 = vector.extract_strided_slice %214 {offsets = [0, 0], sizes = [8, 128], strides = [1, 1]} : vector<8x512xf32> to vector<8x128xf32>
    %216 = arith.negf %215 : vector<8x128xf32>
    %217 = math.exp %216 : vector<8x128xf32>
    %cst_69 = arith.constant 1.000000e+00 : f32
    %218 = vector.broadcast %cst_69 : f32 to vector<8x128xf32>
    %219 = arith.addf %218, %217 : vector<8x128xf32>
    %220 = arith.divf %218, %219 : vector<8x128xf32>
    %221 = vector.extract_strided_slice %214 {offsets = [0, 128], sizes = [8, 128], strides = [1, 1]} : vector<8x512xf32> to vector<8x128xf32>
    %222 = arith.negf %221 : vector<8x128xf32>
    %223 = math.exp %222 : vector<8x128xf32>
    %cst_70 = arith.constant 1.000000e+00 : f32
    %224 = vector.broadcast %cst_70 : f32 to vector<8x128xf32>
    %225 = arith.addf %224, %223 : vector<8x128xf32>
    %226 = arith.divf %224, %225 : vector<8x128xf32>
    %227 = vector.extract_strided_slice %214 {offsets = [0, 256], sizes = [8, 128], strides = [1, 1]} : vector<8x512xf32> to vector<8x128xf32>
    %228 = arith.negf %227 : vector<8x128xf32>
    %229 = math.exp %228 : vector<8x128xf32>
    %cst_71 = arith.constant 1.000000e+00 : f32
    %230 = vector.broadcast %cst_71 : f32 to vector<8x128xf32>
    %231 = arith.addf %230, %229 : vector<8x128xf32>
    %232 = arith.divf %230, %231 : vector<8x128xf32>
    %233 = vector.extract_strided_slice %214 {offsets = [0, 384], sizes = [8, 128], strides = [1, 1]} : vector<8x512xf32> to vector<8x128xf32>
    %234 = math.tanh %233 : vector<8x128xf32>
    %235 = arith.mulf %220, %203 : vector<8x128xf32>
    %236 = arith.mulf %226, %234 : vector<8x128xf32>
    %237 = arith.addf %235, %236 : vector<8x128xf32>
    %238 = arith.mulf %232, %237 : vector<8x128xf32>
    %239 = arith.index_cast %c6_i32 : i32 to index
    %c0_72 = arith.constant 0 : index
    %c0_73 = arith.constant 0 : index
    %240 = vector.load %arg11[%239, %c0_72, %c0_73] : memref<8x8x128xf32, #tpu.memory_space<vmem>>, vector<1x8x128xf32>
    %241 = vector.shape_cast %240 : vector<1x8x128xf32> to vector<8x128xf32>
    %242 = vector.shape_cast %238 : vector<8x128xf32> to vector<1x8x128xf32>
    tpu.vector_store %arg11[%239, %c0_72, %c0_73], %242 {strides = array<i32>} : memref<8x8x128xf32, #tpu.memory_space<vmem>>, vector<1x8x128xf32>,
    %c7_i32 = arith.constant 7 : i32
    %243 = arith.index_cast %c7_i32 : i32 to index
    %c0_74 = arith.constant 0 : index
    %c0_75 = arith.constant 0 : index
    %244 = vector.load %arg2[%243, %c0_74, %c0_75] : memref<8x8x512xf32, #tpu.memory_space<vmem>>, vector<1x8x512xf32>
    %245 = vector.shape_cast %244 : vector<1x8x512xf32> to vector<8x512xf32>
    %c0_76 = arith.constant 0 : index
    %c0_77 = arith.constant 0 : index
    %246 = vector.load %arg5[%c0_76, %c0_77] : memref<128x512xf32, #tpu.memory_space<vmem>>, vector<128x512xf32>
    %cst_78 = arith.constant dense<0.000000e+00> : vector<8x512xf32>
    %247 = tpu.matmul %238, %246, %cst_78 {dimension_numbers = #tpu.dot_dimension_numbers<[1], [0], [0], [1], [0, 0, 1, 1], [], []>} : vector<8x128xf32>, vector<128x512xf32>, vector<8x512xf32> -> vector<8x512xf32>
    %248 = arith.addf %245, %247 : vector<8x512xf32>
    %249 = vector.extract_strided_slice %248 {offsets = [0, 0], sizes = [8, 128], strides = [1, 1]} : vector<8x512xf32> to vector<8x128xf32>
    %250 = arith.negf %249 : vector<8x128xf32>
    %251 = math.exp %250 : vector<8x128xf32>
    %cst_79 = arith.constant 1.000000e+00 : f32
    %252 = vector.broadcast %cst_79 : f32 to vector<8x128xf32>
    %253 = arith.addf %252, %251 : vector<8x128xf32>
    %254 = arith.divf %252, %253 : vector<8x128xf32>
    %255 = vector.extract_strided_slice %248 {offsets = [0, 128], sizes = [8, 128], strides = [1, 1]} : vector<8x512xf32> to vector<8x128xf32>
    %256 = arith.negf %255 : vector<8x128xf32>
    %257 = math.exp %256 : vector<8x128xf32>
    %cst_80 = arith.constant 1.000000e+00 : f32
    %258 = vector.broadcast %cst_80 : f32 to vector<8x128xf32>
    %259 = arith.addf %258, %257 : vector<8x128xf32>
    %260 = arith.divf %258, %259 : vector<8x128xf32>
    %261 = vector.extract_strided_slice %248 {offsets = [0, 256], sizes = [8, 128], strides = [1, 1]} : vector<8x512xf32> to vector<8x128xf32>
    %262 = arith.negf %261 : vector<8x128xf32>
    %263 = math.exp %262 : vector<8x128xf32>
    %cst_81 = arith.constant 1.000000e+00 : f32
    %264 = vector.broadcast %cst_81 : f32 to vector<8x128xf32>
    %265 = arith.addf %264, %263 : vector<8x128xf32>
    %266 = arith.divf %264, %265 : vector<8x128xf32>
    %267 = vector.extract_strided_slice %248 {offsets = [0, 384], sizes = [8, 128], strides = [1, 1]} : vector<8x512xf32> to vector<8x128xf32>
    %268 = math.tanh %267 : vector<8x128xf32>
    %269 = arith.mulf %254, %237 : vector<8x128xf32>
    %270 = arith.mulf %260, %268 : vector<8x128xf32>
    %271 = arith.addf %269, %270 : vector<8x128xf32>
    %272 = arith.mulf %266, %271 : vector<8x128xf32>
    %273 = arith.index_cast %c7_i32 : i32 to index
    %c0_82 = arith.constant 0 : index
    %c0_83 = arith.constant 0 : index
    %274 = vector.load %arg11[%273, %c0_82, %c0_83] : memref<8x8x128xf32, #tpu.memory_space<vmem>>, vector<1x8x128xf32>
    %275 = vector.shape_cast %274 : vector<1x8x128xf32> to vector<8x128xf32>
    %276 = vector.shape_cast %272 : vector<8x128xf32> to vector<1x8x128xf32>
    tpu.vector_store %arg11[%273, %c0_82, %c0_83], %276 {strides = array<i32>} : memref<8x8x128xf32, #tpu.memory_space<vmem>>, vector<1x8x128xf32>,
    %c8_i32 = arith.constant 8 : i32
    %c0_84 = arith.constant 0 : index
    %c0_85 = arith.constant 0 : index
    %277 = vector.load %arg9[%c0_84, %c0_85] : memref<8x128xf32, #tpu.memory_space<vmem>>, vector<8x128xf32>
    tpu.vector_store %arg9[%c0_84, %c0_85], %272 {strides = array<i32>} : memref<8x128xf32, #tpu.memory_space<vmem>>, vector<8x128xf32>,
    %c0_86 = arith.constant 0 : index
    %c0_87 = arith.constant 0 : index
    %278 = vector.load %arg10[%c0_86, %c0_87] : memref<8x128xf32, #tpu.memory_space<vmem>>, vector<8x128xf32>
    tpu.vector_store %arg10[%c0_86, %c0_87], %271 {strides = array<i32>} : memref<8x128xf32, #tpu.memory_space<vmem>>, vector<8x128xf32>,
    %c0_88 = arith.constant 0 : index
    %c0_89 = arith.constant 0 : index
    %c0_90 = arith.constant 0 : index
    %279 = vector.load %arg11[%c0_88, %c0_89, %c0_90] : memref<8x8x128xf32, #tpu.memory_space<vmem>>, vector<8x8x128xf32>
    %280 = vector.shape_cast %279 : vector<8x8x128xf32> to vector<64x128xf32>
    %c0_91 = arith.constant 0 : index
    %c0_92 = arith.constant 0 : index
    %281 = vector.load %arg6[%c0_91, %c0_92] : memref<128x128xf32, #tpu.memory_space<vmem>>, vector<128x128xf32>
    %cst_93 = arith.constant dense<0.000000e+00> : vector<64x128xf32>
    %282 = tpu.matmul %280, %281, %cst_93 {dimension_numbers = #tpu.dot_dimension_numbers<[1], [0], [0], [1], [0, 0, 1, 1], [], []>} : vector<64x128xf32>, vector<128x128xf32>, vector<64x128xf32> -> vector<64x128xf32>
    %c0_94 = arith.constant 0 : index
    %c0_95 = arith.constant 0 : index
    %283 = vector.load %arg7[%c0_94, %c0_95] : memref<1x128xf32, #tpu.memory_space<vmem>>, vector<1x128xf32>
    %284 = vector.broadcast %283 : vector<1x128xf32> to vector<64x128xf32>
    %285 = arith.addf %282, %284 : vector<64x128xf32>
    %286 = vector.shape_cast %285 : vector<64x128xf32> to vector<8x8x128xf32>
    %c0_96 = arith.constant 0 : index
    %c0_97 = arith.constant 0 : index
    %c0_98 = arith.constant 0 : index
    %287 = vector.load %arg8[%c0_96, %c0_97, %c0_98] : memref<8x8x128xf32, #tpu.memory_space<vmem>>, vector<8x8x128xf32>
    tpu.vector_store %arg8[%c0_96, %c0_97, %c0_98], %286 {strides = array<i32>} : memref<8x8x128xf32, #tpu.memory_space<vmem>>, vector<8x8x128xf32>,
    return
  }
  func.func @transform_0(%arg0: i32, %arg1: i32) -> (i32, i32, i32) {
    %c0_i32 = arith.constant 0 : i32
    %c0_i32_0 = arith.constant 0 : i32
    return %arg1, %arg0, %c0_i32 : i32, i32, i32
  }
  func.func @transform_1(%arg0: i32, %arg1: i32) -> (i32, i32) {
    %c0_i32 = arith.constant 0 : i32
    %c0_i32_0 = arith.constant 0 : i32
    return %arg0, %c0_i32 : i32, i32
  }
  func.func @transform_2(%arg0: i32, %arg1: i32) -> (i32, i32) {
    %c0_i32 = arith.constant 0 : i32
    %c0_i32_0 = arith.constant 0 : i32
    return %arg0, %c0_i32 : i32, i32
  }
  func.func @transform_3(%arg0: i32, %arg1: i32) -> (i32, i32) {
    %c0_i32 = arith.constant 0 : i32
    %c0_i32_0 = arith.constant 0 : i32
    %c0_i32_1 = arith.constant 0 : i32
    return %c0_i32, %c0_i32_0 : i32, i32
  }
  func.func @transform_4(%arg0: i32, %arg1: i32) -> (i32, i32) {
    %c0_i32 = arith.constant 0 : i32
    %c0_i32_0 = arith.constant 0 : i32
    %c0_i32_1 = arith.constant 0 : i32
    return %c0_i32, %c0_i32_0 : i32, i32
  }
  func.func @transform_5(%arg0: i32, %arg1: i32) -> (i32, i32) {
    %c0_i32 = arith.constant 0 : i32
    %c0_i32_0 = arith.constant 0 : i32
    %c0_i32_1 = arith.constant 0 : i32
    return %c0_i32, %c0_i32_0 : i32, i32
  }
  func.func @transform_6(%arg0: i32, %arg1: i32) -> (i32, i32, i32) {
    %c0_i32 = arith.constant 0 : i32
    %c0_i32_0 = arith.constant 0 : i32
    return %arg1, %arg0, %c0_i32 : i32, i32, i32
  }
  func.func @transform_7(%arg0: i32, %arg1: i32) -> (i32, i32) {
    %c0_i32 = arith.constant 0 : i32
    %c0_i32_0 = arith.constant 0 : i32
    return %arg0, %c0_i32 : i32, i32
  }
  func.func @transform_8(%arg0: i32, %arg1: i32) -> (i32, i32) {
    %c0_i32 = arith.constant 0 : i32
    %c0_i32_0 = arith.constant 0 : i32
    return %arg0, %c0_i32 : i32, i32
  }
}

</mosaic_0001>

<bundles_post_ra>
// kernel: lstm_forward.1
= control target key start
LH: loop header
LB: loop body
LE: loop exit
PB: predicated region body
PF: predicated region fallthrough
CT: control target
= control target key end

     0   :  { %14 = vsyncpa [#allocation4], 0  ;;  %s4654_s0 = inlined_call_operand.vmem [shape: f32[16,8,512], index: 0, kind: input, shape index: {}]   ;;  %s4655_s1 = inlined_call_operand.vmem [shape: f32[8,128], index: 1, kind: input, shape index: {}]   ;;  %s4656_s2 = inlined_call_operand.vmem [shape: f32[8,128], index: 2, kind: input, shape index: {}]   ;;  %s4657_s3 = inlined_call_operand.vmem [shape: f32[128,512], index: 3, kind: input, shape index: {}]   ;;  %s4658_s4 = inlined_call_operand.vmem [shape: f32[128,128], index: 4, kind: input, shape index: {}]   ;;  %s4659_s5 = inlined_call_operand.vmem [shape: f32[1,128], index: 5, kind: input, shape index: {}]   ;;  %s4660_s6 = inlined_call_operand.hbm [shape: f32[16,8,128], index: 6, kind: output, shape index: {0}]   ;;  %s4661_s7 = inlined_call_operand.hbm [shape: f32[8,128], index: 7, kind: output, shape index: {1}]   ;;  %s4662_s8 = inlined_call_operand.hbm [shape: f32[8,128], index: 8, kind: output, shape index: {2}]  }
   0x1   :  { %16 = vsyncpa [#allocation4 + $0x1], 0 }
   0x2   :  { %17 = vsyncpa [#allocation6], 0  ;;  %s3138_s27 = smov 0   ;;  %s3140_s28 = smov 0  }
   0x3   :  { %s3142_s29 = smov 0   ;;  %s3144_s30 = smov 0  }
   0x4   :  { %s3146_s9 = smov 0   ;;  %s3148_s10 = smov 0  }
   0x5 LB: > { %s2629_s11 = sadd.s32 4294967295, %s3085_s10   ;;  %s2630_s12 = sadd.s32 4294967294, %s3085_s10   ;;  %s3085_s10 = sphi %s3148_s10, %s23_s10   ;;  %s3081_s9 = sphi %s3146_s9, %s4877_s9   ;;  %s3077_s30 = sphi %s3144_s30, %s4876_s30   ;;  %s3073_s29 = sphi %s3142_s29, %s4875_s29   ;;  %s3069_s28 = sphi %s3140_s28, %s4874_s28   ;;  %s3065_s27 = sphi %s3138_s27, %s4873_s27  }
   0x6   : > { %s32_s13 = sadd.s32 1, %s3081_s9  ;;  %s187_s14 = sadd.s32 1, %s3073_s29 }
   0x7   : > { %p33_p0 = scmp.ge.s32.totalorder %s32_s13, 2  ;;  %p197_p1 = scmp.ne.s32.totalorder %s3073_s29, %s3069_s28 }
   0x8   : > { %p3174_p2 = scmp.eq.s32.totalorder %s2629_s11, 1  ;;  %p203_p3 = scmp.ne.s32.totalorder %s3069_s28, %s3065_s27 }
   0x9   : > { %s4879_s13 = smov (%p33_p0, %s32_s13), 0  ;;  %p204_p5 = scmp.eq.s32.totalorder %s2630_s12, 1 }
   0xa   : > { %4745 = sst [smem:[#allocation10_spill]] %s4879_s13  ;;  %p3184_p4 = por %p3174_p2, %p197_p1 }
   0xb   : > { %s182_s17 = ssub.s32 %s3081_s9, %s4879_s13  ;;  %p2635_p6 = scmp.ge.s32.totalorder %s3085_s10, 1 }
   0xc   : > { %p185_p7 = scmp.eq.s32.totalorder %s182_s17, 0  ;;  %p3191_p8 = por %p204_p5, %p203_p3 }
   0xd   : > { %p311_p9 = scmp.lt.s32.totalorder %s3085_s10, 3 }
   0xe   : > { %s3197_s19 = scalar_select %p185_p7, %s3073_s29, %s187_s14  }
   0xf   : > { %p312_p10 = pnand %p2635_p6, %p311_p9 }
  0x11   : > { %315 = sbr.rel (%p312_p10) target bundleno = 2186 (0x88a), region = 44 }
  0x16   : > { %s4743_s20 = sand.u32 1, %s3069_s28   ;;  %s2637_s21 = sshll.u32 %s3077_s30, 3 }
  0x17   : > { %s2636_s22 = sshll.u32 %s4743_s20, 6  ;;  %p359_p11 = scmp.lt.s32.totalorder %s2637_s21, 15 }
  0x18   : > { %s3208_s11 = scalar_lea.vmem [#allocation3], %s2636_s22  ;;  %p2640_p12 = scmp.ne.s32.totalorder %s3077_s30, 0 }
  0x19   : > { %s4881_s21 = smov (!%p359_p11, %s2637_s21), 15 }
  0x1a   : > { %s2703_s23 = sshll.u32 %s4881_s21, 5  ;;  %381 = sbr.rel (%p2640_p12) target bundleno = 34 (0x22), region = 48 }
  0x1b   : > { %s3206_s26 = scalar_lea.vmem %s4654_s0, %s2703_s23 }
  0x1f   : > { %v382_v0 = vld [vmem:[%s4655_s1] sm:$0xff] }
  0x20   : > { %v384_v1 = vld [vmem:[%s4656_s2] sm:$0xff]  ;;  %383 = vst [vmem:[#allocation5] sm:$0xff] %v382_v0 }
  0x21   : > { %385 = vst [vmem:[#allocation7] sm:$0xff] %v384_v1 }
  0x22 PF: > { %v3220_v2 = vld [vmem:[%s4657_s3 + $0x1e8] sm:$0xff]  ;;  %v3225_v3 = vld [vmem:[%s4657_s3 + $0x1e0] sm:$0xff]  ;;  %v4664_v6 = vmov 0.0   ;;  %v3441_v36 = vld [vmem:[%s4657_s3 + $0x1f8] sm:$0xff] }
  0x23   : > { %4748 = vst [vmem:[#allocation11_spill] sm:$0xff] %v3220_v2  ;;  %v3230_v4 = vld [vmem:[%s4657_s3 + $0x1c8] sm:$0xff]  ;;  %456 = vmatprep.subr.mxu1 %v3220_v2  ;;  %v3236_v5 = vld [vmem:[%s4657_s3 + $0x1c0] sm:$0xff]  ;;  %520 = vmatprep.mubr.f32.mxu1 %v4664_v6  ;;  %4757 = vst [vmem:[#allocation20_spill] sm:$0xff] %v3441_v36 }
  0x24   : > { %457 = vmatpush1.msra.mxu1 %v3225_v3  ;;  %v3243_v7 = vld [vmem:[%s4657_s3 + $0x1a8] sm:$0xff]  ;;  %695 = vmatprep.subr.mxu0 %v3220_v2  ;;  %v3250_v8 = vld [vmem:[%s4657_s3 + $0x1a0] sm:$0xff]  ;;  %v3448_v37 = vld [vmem:[%s4657_s3 + $0x1f0] sm:$0xff] }
  0x25   : > { %458 = vmatprep.subr.mxu1 %v3230_v4  ;;  %696 = vmatpush1.msra.mxu0 %v3225_v3  ;;  %v3257_v9 = vld [vmem:[%s4657_s3 + $0x188] sm:$0xff]  ;;  %v3264_v10 = vld [vmem:[%s4657_s3 + $0x180] sm:$0xff]  ;;  %v3455_v38 = vld [vmem:[%s4657_s3 + $0x1d8] sm:$0xff] }
  0x26   : > { %459 = vmatpush1.msra.mxu1 %v3236_v5  ;;  %697 = vmatprep.subr.mxu0 %v3230_v4  ;;  %v3271_v11 = vld [vmem:[%s4657_s3 + $0x168] sm:$0xff]  ;;  %v3278_v12 = vld [vmem:[%s4657_s3 + $0x160] sm:$0xff]  ;;  %v3463_v39 = vld [vmem:[%s4657_s3 + $0x1d0] sm:$0xff] }
  0x27   : > { %460 = vmatprep.subr.mxu1 %v3243_v7  ;;  %698 = vmatpush1.msra.mxu0 %v3236_v5  ;;  %v3285_v13 = vld [vmem:[%s4657_s3 + $0x148] sm:$0xff]  ;;  %v3292_v14 = vld [vmem:[%s4657_s3 + $0x140] sm:$0xff]  ;;  %v3469_v40 = vld [vmem:[%s4657_s3 + $0x1b8] sm:$0xff] }
  0x28   : > { %461 = vmatpush1.msra.mxu1 %v3250_v8  ;;  %699 = vmatprep.subr.mxu0 %v3243_v7  ;;  %v3299_v15 = vld [vmem:[%s4657_s3 + $0x128] sm:$0xff]  ;;  %v3306_v16 = vld [vmem:[%s4657_s3 + $0x120] sm:$0xff]  ;;  %v3476_v41 = vld [vmem:[%s4657_s3 + $0x1b0] sm:$0xff] }
  0x29   : > { %462 = vmatprep.subr.mxu1 %v3257_v9  ;;  %700 = vmatpush1.msra.mxu0 %v3250_v8  ;;  %v3313_v17 = vld [vmem:[%s4657_s3 + $0x108] sm:$0xff]  ;;  %v3320_v18 = vld [vmem:[%s4657_s3 + $0x100] sm:$0xff]  ;;  %v3483_v42 = vld [vmem:[%s4657_s3 + $0x198] sm:$0xff] }
  0x2a   : > { %463 = vmatpush1.msra.mxu1 %v3264_v10  ;;  %701 = vmatprep.subr.mxu0 %v3257_v9  ;;  %v3327_v19 = vld [vmem:[%s4657_s3 + $0xe8] sm:$0xff]  ;;  %v3334_v20 = vld [vmem:[%s4657_s3 + $0xe0] sm:$0xff]  ;;  %v3490_v43 = vld [vmem:[%s4657_s3 + $0x190] sm:$0xff] }
  0x2b   : > { %464 = vmatprep.subr.mxu1 %v3271_v11  ;;  %702 = vmatpush1.msra.mxu0 %v3264_v10  ;;  %v3341_v21 = vld [vmem:[%s4657_s3 + $0xc8] sm:$0xff]  ;;  %v3348_v22 = vld [vmem:[%s4657_s3 + $0xc0] sm:$0xff]  ;;  %v3497_v44 = vld [vmem:[%s4657_s3 + $0x178] sm:$0xff] }
  0x2c   : > { %465 = vmatpush1.msra.mxu1 %v3278_v12  ;;  %703 = vmatprep.subr.mxu0 %v3271_v11  ;;  %v3355_v23 = vld [vmem:[%s4657_s3 + $0xa8] sm:$0xff]  ;;  %v3362_v24 = vld [vmem:[%s4657_s3 + $0xa0] sm:$0xff]  ;;  %v3503_v45 = vld [vmem:[%s4657_s3 + $0x170] sm:$0xff] }
  0x2d   : > { %466 = vmatprep.subr.mxu1 %v3285_v13  ;;  %704 = vmatpush1.msra.mxu0 %v3278_v12  ;;  %v3369_v25 = vld [vmem:[%s4657_s3 + $0x88] sm:$0xff]  ;;  %v3376_v26 = vld [vmem:[%s4657_s3 + $0x80] sm:$0xff]  ;;  %v3509_v46 = vld [vmem:[%s4657_s3 + $0x158] sm:$0xff] }
  0x2e   : > { %467 = vmatpush1.msra.mxu1 %v3292_v14  ;;  %705 = vmatprep.subr.mxu0 %v3285_v13  ;;  %v3383_v27 = vld [vmem:[%s4657_s3 + $0x68] sm:$0xff]  ;;  %v3390_v28 = vld [vmem:[%s4657_s3 + $0x60] sm:$0xff]  ;;  %v3515_v47 = vld [vmem:[%s4657_s3 + $0x150] sm:$0xff] }
  0x2f   : > { %468 = vmatprep.subr.mxu1 %v3299_v15  ;;  %706 = vmatpush1.msra.mxu0 %v3292_v14  ;;  %4749 = vst [vmem:[#allocation12_spill] sm:$0xff] %v3383_v27  ;;  %4750 = vst [vmem:[#allocation13_spill] sm:$0xff] %v3390_v28  ;;  %v3397_v29 = vld [vmem:[%s4657_s3 + $0x48] sm:$0xff]  ;;  %v3404_v30 = vld [vmem:[%s4657_s3 + $0x40] sm:$0xff] }
  0x30   : > { %469 = vmatpush1.msra.mxu1 %v3306_v16  ;;  %707 = vmatprep.subr.mxu0 %v3299_v15  ;;  %4751 = vst [vmem:[#allocation14_spill] sm:$0xff] %v3397_v29  ;;  %4752 = vst [vmem:[#allocation15_spill] sm:$0xff] %v3404_v30  ;;  %v3411_v31 = vld [vmem:[%s4657_s3 + $0x28] sm:$0xff]  ;;  %v3418_v32 = vld [vmem:[%s4657_s3 + $0x20] sm:$0xff] }
  0x31   : > { %470 = vmatprep.subr.mxu1 %v3313_v17  ;;  %708 = vmatpush1.msra.mxu0 %v3306_v16  ;;  %4753 = vst [vmem:[#allocation16_spill] sm:$0xff] %v3411_v31  ;;  %4754 = vst [vmem:[#allocation17_spill] sm:$0xff] %v3418_v32  ;;  %v3425_v33 = vld [vmem:[%s4657_s3 + $0x8] sm:$0xff]  ;;  %v3432_v34 = vld [vmem:[%s4657_s3] sm:$0xff] }
  0x32   : > { %471 = vmatpush1.msra.mxu1 %v3320_v18  ;;  %709 = vmatprep.subr.mxu0 %v3313_v17  ;;  %4755 = vst [vmem:[#allocation18_spill] sm:$0xff] %v3425_v33  ;;  %4756 = vst [vmem:[#allocation19_spill] sm:$0xff] %v3432_v34  ;;  %v3436_v35 = vld [vmem:[#allocation5] sm:$0xff]  ;;  %v3521_v48 = vld [vmem:[%s4657_s3 + $0x138] sm:$0xff] }
  0x33   : > { %472 = vmatprep.subr.mxu1 %v3327_v19  ;;  %710 = vmatpush1.msra.mxu0 %v3320_v18  ;;  %v3527_v49 = vld [vmem:[%s4657_s3 + $0x130] sm:$0xff]  ;;  %v3533_v50 = vld [vmem:[%s4657_s3 + $0x118] sm:$0xff] }
  0x34   : > { %473 = vmatpush1.msra.mxu1 %v3334_v20  ;;  %711 = vmatprep.subr.mxu0 %v3327_v19  ;;  %v3539_v51 = vld [vmem:[%s4657_s3 + $0x110] sm:$0xff]  ;;  %v3545_v52 = vld [vmem:[%s4657_s3 + $0xf8] sm:$0xff] }
  0x35   : > { %474 = vmatprep.subr.mxu1 %v3341_v21  ;;  %712 = vmatpush1.msra.mxu0 %v3334_v20  ;;  %v3551_v53 = vld [vmem:[%s4657_s3 + $0xf0] sm:$0xff]  ;;  %v3557_v54 = vld [vmem:[%s4657_s3 + $0xd8] sm:$0xff] }
  0x36   : > { %475 = vmatpush1.msra.mxu1 %v3348_v22  ;;  %713 = vmatprep.subr.mxu0 %v3341_v21  ;;  %v3563_v55 = vld [vmem:[%s4657_s3 + $0xd0] sm:$0xff]  ;;  %v3569_v56 = vld [vmem:[%s4657_s3 + $0xb8] sm:$0xff] }
  0x37   : > { %476 = vmatprep.subr.mxu1 %v3355_v23  ;;  %714 = vmatpush1.msra.mxu0 %v3348_v22  ;;  %v3575_v57 = vld [vmem:[%s4657_s3 + $0xb0] sm:$0xff]  ;;  %v3581_v58 = vld [vmem:[%s4657_s3 + $0x98] sm:$0xff] }
  0x38   : > { %477 = vmatpush1.msra.mxu1 %v3362_v24  ;;  %715 = vmatprep.subr.mxu0 %v3355_v23  ;;  %v3587_v59 = vld [vmem:[%s4657_s3 + $0x90] sm:$0xff]  ;;  %v3593_v60 = vld [vmem:[%s4657_s3 + $0x78] sm:$0xff] }
  0x39   : > { %478 = vmatprep.subr.mxu1 %v3369_v25  ;;  %716 = vmatpush1.msra.mxu0 %v3362_v24  ;;  %4758 = vst [vmem:[#allocation21_spill] sm:$0xff] %v3587_v59  ;;  %4759 = vst [vmem:[#allocation22_spill] sm:$0xff] %v3593_v60  ;;  %v3599_v61 = vld [vmem:[%s4657_s3 + $0x70] sm:$0xff]  ;;  %v3605_v62 = vld [vmem:[%s4657_s3 + $0x58] sm:$0xff] }
  0x3a   : > { %479 = vmatpush1.msra.mxu1 %v3376_v26  ;;  %717 = vmatprep.subr.mxu0 %v3369_v25  ;;  %4760 = vst [vmem:[#allocation23_spill] sm:$0xff] %v3599_v61  ;;  %4761 = vst [vmem:[#allocation24_spill] sm:$0xff] %v3605_v62  ;;  %v3611_v63 = vld [vmem:[%s4657_s3 + $0x50] sm:$0xff]  ;;  %v3617_v0 = vld [vmem:[%s4657_s3 + $0x38] sm:$0xff] }
  0x3b   : > { %480 = vmatprep.subr.mxu1 %v3383_v27  ;;  %718 = vmatpush1.msra.mxu0 %v3376_v26  ;;  %4762 = vst [vmem:[#allocation25_spill] sm:$0xff] %v3611_v63  ;;  %4763 = vst [vmem:[#allocation26_spill] sm:$0xff] %v3617_v0  ;;  %v3623_v1 = vld [vmem:[%s4657_s3 + $0x30] sm:$0xff] }
  0x3c   : > { %481 = vmatpush1.msra.mxu1 %v3390_v28  ;;  %719 = vmatprep.subr.mxu0 %v3383_v27  ;;  %4764 = vst [vmem:[#allocation27_spill] sm:$0xff] %v3623_v1 }
  0x3d   : > { %482 = vmatprep.subr.mxu1 %v3397_v29  ;;  %720 = vmatpush1.msra.mxu0 %v3390_v28 }
  0x3e   : > { %483 = vmatpush1.msra.mxu1 %v3404_v30  ;;  %721 = vmatprep.subr.mxu0 %v3397_v29 }
  0x3f   : > { %484 = vmatprep.subr.mxu1 %v3411_v31  ;;  %722 = vmatpush1.msra.mxu0 %v3404_v30 }
  0x40   : > { %485 = vmatpush1.msra.mxu1 %v3418_v32  ;;  %723 = vmatprep.subr.mxu0 %v3411_v31 }
  0x41   : > { %486 = vmatprep.subr.mxu1 %v3425_v33  ;;  %724 = vmatpush1.msra.mxu0 %v3418_v32 }
  0x42   : > { %487 = vmatpush1.msra.mxu1 %v3432_v34  ;;  %725 = vmatprep.subr.mxu0 %v3425_v33  ;;  %v389_v33 = vld [vmem:[%s3206_s26 + $0x8] sm:$0xff] }
  0x43   : > { %521 = vmatmul.mubr.f32.vlgmr.msra.gmra.mxu1 %v3436_v35  ;;  %527 = vmatprep.subr.mxu1 %v3441_v36 }
  0x44   : > { %528 = vmatpush1.msra.mxu1 %v3448_v37  ;;  %591 = vmatprep.mubr.f32.mxu1 %v4664_v6 }
  0x45   : > { %529 = vmatprep.subr.mxu1 %v3455_v38  ;;  %726 = vmatpush1.msra.mxu0 %v3432_v34  ;;  %v4767_v34 = vmov 0.0  }
  0x46   : > { %530 = vmatpush1.msra.mxu1 %v3463_v39  ;;  %759 = vmatprep.mubr.f32.mxu0 %v4664_v6  ;;  %v3629_v6 = vld [vmem:[%s4657_s3 + $0x18] sm:$0xff] }
  0x47   : > { %531 = vmatprep.subr.mxu1 %v3469_v40  ;;  %935 = vmatprep.subr.mxu0 %v3220_v2  ;;  %4765 = vst [vmem:[#allocation28_spill] sm:$0xff] %v3629_v6  ;;  %v3635_v2 = vld [vmem:[%s4657_s3 + $0x10] sm:$0xff] }
  0x48   : > { %532 = vmatpush1.msra.mxu1 %v3476_v41  ;;  %4766 = vst [vmem:[#allocation29_spill] sm:$0xff] %v3635_v2 }
  0x49   : > { %533 = vmatprep.subr.mxu1 %v3483_v42 }
  0x4a   : > { %534 = vmatpush1.msra.mxu1 %v3490_v43 }
  0x4b   : > { %535 = vmatprep.subr.mxu1 %v3497_v44 }
  0x4c   : > { %536 = vmatpush1.msra.mxu1 %v3503_v45 }
  0x4d   : > { %537 = vmatprep.subr.mxu1 %v3509_v46 }
  0x4e   : > { %538 = vmatpush1.msra.mxu1 %v3515_v47 }
  0x4f   : > { %539 = vmatprep.subr.mxu1 %v3521_v48 }
  0x50   : > { %540 = vmatpush1.msra.mxu1 %v3527_v49 }
  0x51   : > { %541 = vmatprep.subr.mxu1 %v3533_v50 }
  0x52   : > { %542 = vmatpush1.msra.mxu1 %v3539_v51 }
  0x53   : > { %543 = vmatprep.subr.mxu1 %v3545_v52 }
  0x54   : > { %544 = vmatpush1.msra.mxu1 %v3551_v53 }
  0x55   : > { %545 = vmatprep.subr.mxu1 %v3557_v54 }
  0x56   : > { %546 = vmatpush1.msra.mxu1 %v3563_v55 }
  0x57   : > { %547 = vmatprep.subr.mxu1 %v3569_v56 }
  0x58   : > { %548 = vmatpush1.msra.mxu1 %v3575_v57 }
  0x59   : > { %549 = vmatprep.subr.mxu1 %v3581_v58 }
  0x5a   : > { %550 = vmatpush1.msra.mxu1 %v3587_v59 }
  0x5b   : > { %551 = vmatprep.subr.mxu1 %v3593_v60 }
  0x5c   : > { %552 = vmatpush1.msra.mxu1 %v3599_v61 }
  0x5d   : > { %553 = vmatprep.subr.mxu1 %v3605_v62 }
  0x5e   : > { %554 = vmatpush1.msra.mxu1 %v3611_v63 }
  0x5f   : > { %555 = vmatprep.subr.mxu1 %v3617_v0 }
  0x60   : > { %556 = vmatpush1.msra.mxu1 %v3623_v1 }
  0x61   : > { %557 = vmatprep.subr.mxu1 %v3629_v6 }
  0x62   : > { %558 = vmatpush1.msra.mxu1 %v3635_v2 }
  0x63   : > { %592 = vmatmul.mubr.f32.vlgmr.msra.gmra.mxu1 %v3436_v35  ;;  %766 = vmatprep.subr.mxu1 %v3441_v36 }
  0x64   : > { %767 = vmatpush1.msra.mxu1 %v3448_v37  ;;  %830 = vmatprep.mubr.f32.mxu1 %v4767_v34  ;;  %v388_v34 = vld [vmem:[%s3206_s26] sm:$0xff] }
  0x65   : > { %768 = vmatprep.subr.mxu1 %v3455_v38 }
  0x66   : > { %769 = vmatpush1.msra.mxu1 %v3463_v39 }
  0x67   : > { %770 = vmatprep.subr.mxu1 %v3469_v40 }
  0x68   : > { %771 = vmatpush1.msra.mxu1 %v3476_v41 }
  0x69   : > { %772 = vmatprep.subr.mxu1 %v3483_v42 }
  0x6a   : > { %773 = vmatpush1.msra.mxu1 %v3490_v43 }
  0x6b   : > { %774 = vmatprep.subr.mxu1 %v3497_v44 }
  0x6c   : > { %775 = vmatpush1.msra.mxu1 %v3503_v45 }
  0x6d   : > { %776 = vmatprep.subr.mxu1 %v3509_v46 }
  0x6e   : > { %777 = vmatpush1.msra.mxu1 %v3515_v47 }
  0x6f   : > { %778 = vmatprep.subr.mxu1 %v3521_v48 }
  0x70   : > { %779 = vmatpush1.msra.mxu1 %v3527_v49 }
  0x71   : > { %780 = vmatprep.subr.mxu1 %v3533_v50 }
  0x72   : > { %781 = vmatpush1.msra.mxu1 %v3539_v51 }
  0x73   : > { %782 = vmatprep.subr.mxu1 %v3545_v52 }
  0x74   : > { %783 = vmatpush1.msra.mxu1 %v3551_v53 }
  0x75   : > { %784 = vmatprep.subr.mxu1 %v3557_v54 }
  0x76   : > { %785 = vmatpush1.msra.mxu1 %v3563_v55 }
  0x77   : > { %786 = vmatprep.subr.mxu1 %v3569_v56 }
  0x78   : > { %787 = vmatpush1.msra.mxu1 %v3575_v57 }
  0x79   : > { %788 = vmatprep.subr.mxu1 %v3581_v58 }
  0x7a   : > { %789 = vmatpush1.msra.mxu1 %v3587_v59 }
  0x7b   : > { %790 = vmatprep.subr.mxu1 %v3593_v60 }
  0x7c   : > { %791 = vmatpush1.msra.mxu1 %v3599_v61 }
  0x7d   : > { %792 = vmatprep.subr.mxu1 %v3605_v62 }
  0x7e   : > { %793 = vmatpush1.msra.mxu1 %v3611_v63 }
  0x7f   : > { %794 = vmatprep.subr.mxu1 %v3617_v0  ;;  %v390_v0 = vld [vmem:[%s3206_s26 + $0x10] sm:$0xff] }
  0x80   : > { %795 = vmatpush1.msra.mxu1 %v3623_v1 }
  0x81   : > { %796 = vmatprep.subr.mxu1 %v3629_v6  ;;  %v391_v6 = vld [vmem:[%s3206_s26 + $0x18] sm:$0xff] }
  0x82   : > { %797 = vmatpush1.msra.mxu1 %v3635_v2 }
  0x83   : > { %1006 = vmatprep.subr.mxu1 %v3441_v36 }
 0x103   : > { %v522_v35 = vpop.f32.mrf.mxu1 }
 0x104   : > { %v598_v31 = vadd.f32 %v522_v35, %v388_v34  ;;  %v4784_v35 = vld [vmem:[#allocation19_spill] sm:$0xff] }
 0x105   : > { %v524_v32 = vpop.f32.mrf.mxu1 }
 0x106   : > { %v599_v30 = vadd.f32 %v524_v32, %v389_v33  ;;  %v2641_v62 = vmul.f32 -1.442695, %v598_v31 }
 0x108   : > { %v2642_v63 = vmul.f32 -1.442695, %v599_v30  ;;  %2845 = vpow2.f32 %v2641_v62  ;;  %v387_v62 = vld [vmem:[#allocation7] sm:$0xff] }
 0x10a   : > { %2847 = vpow2.f32 %v2642_v63 }
 0x115   : > { %v2846_v28 = vpop.eup %2845 }
 0x116   : > { %v605_v27 = vadd.f32 1.0, %v2846_v28  ;;  %v4780_v28 = vld [vmem:[#allocation17_spill] sm:$0xff] }
 0x117   : > { %v2848_v36 = vpop.eup %2847 }
 0x118   : > { %v611_v59 = vadd.f32 1.0, %v2848_v36  ;;  %v4781_v36 = vld [vmem:[#allocation27_spill] sm:$0xff] }
 0x123   : > { %v593_v29 = vpop.f32.mrf.mxu1 }
 0x124   : > { %v600_v1 = vadd.f32 %v593_v29, %v390_v0 }
 0x125   : > { %v595_v2 = vpop.f32.mrf.mxu1 }
 0x126   : > { %v2643_v61 = vmul.f32 -1.442695, %v600_v1  ;;  %v601_v60 = vadd.f32 %v595_v2, %v391_v6  ;;  %v4769_v2 = vld [vmem:[#allocation21_spill] sm:$0xff]  ;;  %v4770_v6 = vld [vmem:[#allocation12_spill] sm:$0xff] }
 0x128   : > { %2849 = vpow2.f32 %v2643_v61 }
 0x129   : > { %2851 = vtanh.f32 %v601_v60  ;;  %v4783_v60 = vld [vmem:[#allocation28_spill] sm:$0xff] }
 0x12a   : > { %2853 = vrcp.f32 %v605_v27  ;;  %v4779_v27 = vld [vmem:[#allocation26_spill] sm:$0xff] }
 0x12b   : > { %2855 = vrcp.f32 %v611_v59  ;;  %v4782_v59 = vld [vmem:[#allocation18_spill] sm:$0xff] }
 0x135   : > { %v2850_v32 = vpop.eup %2849 }
 0x136   : > { %v617_v31 = vadd.f32 1.0, %v2850_v32  ;;  %v2852_v30 = vpop.eup %2851  ;;  %v4785_v32 = vmov 0.0  }
 0x137   : > { %v2854_v33 = vpop.eup %2853 }
 0x138   : > { %2857 = vrcp.f32 %v617_v31  ;;  %v2856_v34 = vpop.eup %2855  ;;  %v621_v63 = vmul.f32 %v2854_v33, %v387_v62  ;;  %v4786_v31 = vld [vmem:[#allocation29_spill] sm:$0xff]  ;;  %v4788_v33 = vld [vmem:[#allocation20_spill] sm:$0xff]  ;;  %v2646_v62 = vld [vmem:[%s3206_s26 + $0x30] sm:$0xff] }
 0x139   : > { %v622_v29 = vmul.f32 %v2856_v34, %v2852_v30  ;;  %v4787_v30 = vld [vmem:[#allocation11_spill] sm:$0xff]  ;;  %v2644_v34 = vld [vmem:[%s3206_s26 + $0x20] sm:$0xff] }
 0x13b   : > { %v3679_v61 = vadd.f32 %v622_v29, %v621_v63 }
 0x145   : > { %v2858_v0 = vpop.eup %2857 }
 0x146   : > { %v3682_v1 = vmul.f32 %v2858_v0, %v3679_v61  ;;  %v2645_v0 = vld [vmem:[%s3206_s26 + $0x28] sm:$0xff] }
 0x148   : > { %4768 = vst [vmem:[#allocation30_spill] sm:$0xff] %v3682_v1  ;;  %760 = vmatmul.mubr.f32.vlgmr.msra.gmra.mxu0 %v3682_v1  ;;  %831 = vmatmul.mubr.f32.vlgmr.msra.gmra.mxu1 %v3682_v1 }
 0x149   : > { %936 = vmatpush1.msra.mxu0 %v3225_v3  ;;  %1007 = vmatpush1.msra.mxu1 %v3448_v37 }
 0x14a   : > { %937 = vmatprep.subr.mxu0 %v3230_v4  ;;  %1008 = vmatprep.subr.mxu1 %v3455_v38 }
 0x14b   : > { %938 = vmatpush1.msra.mxu0 %v3236_v5  ;;  %1009 = vmatpush1.msra.mxu1 %v3463_v39 }
 0x14c   : > { %939 = vmatprep.subr.mxu0 %v3243_v7  ;;  %1010 = vmatprep.subr.mxu1 %v3469_v40 }
 0x14d   : > { %940 = vmatpush1.msra.mxu0 %v3250_v8  ;;  %1011 = vmatpush1.msra.mxu1 %v3476_v41 }
 0x14e   : > { %941 = vmatprep.subr.mxu0 %v3257_v9  ;;  %1012 = vmatprep.subr.mxu1 %v3483_v42 }
 0x14f   : > { %942 = vmatpush1.msra.mxu0 %v3264_v10  ;;  %1013 = vmatpush1.msra.mxu1 %v3490_v43 }
 0x150   : > { %943 = vmatprep.subr.mxu0 %v3271_v11  ;;  %1014 = vmatprep.subr.mxu1 %v3497_v44 }
 0x151   : > { %944 = vmatpush1.msra.mxu0 %v3278_v12  ;;  %1015 = vmatpush1.msra.mxu1 %v3503_v45 }
 0x152   : > { %945 = vmatprep.subr.mxu0 %v3285_v13  ;;  %1016 = vmatprep.subr.mxu1 %v3509_v46 }
 0x153   : > { %946 = vmatpush1.msra.mxu0 %v3292_v14  ;;  %1017 = vmatpush1.msra.mxu1 %v3515_v47 }
 0x154   : > { %947 = vmatprep.subr.mxu0 %v3299_v15  ;;  %1018 = vmatprep.subr.mxu1 %v3521_v48 }
 0x155   : > { %948 = vmatpush1.msra.mxu0 %v3306_v16  ;;  %1019 = vmatpush1.msra.mxu1 %v3527_v49 }
 0x156   : > { %949 = vmatprep.subr.mxu0 %v3313_v17  ;;  %1020 = vmatprep.subr.mxu1 %v3533_v50 }
 0x157   : > { %950 = vmatpush1.msra.mxu0 %v3320_v18  ;;  %1021 = vmatpush1.msra.mxu1 %v3539_v51 }
 0x158   : > { %951 = vmatprep.subr.mxu0 %v3327_v19  ;;  %1022 = vmatprep.subr.mxu1 %v3545_v52  ;;  %v4771_v19 = vld [vmem:[#allocation22_spill] sm:$0xff] }
 0x159   : > { %952 = vmatpush1.msra.mxu0 %v3334_v20  ;;  %1023 = vmatpush1.msra.mxu1 %v3551_v53  ;;  %v4772_v20 = vld [vmem:[#allocation13_spill] sm:$0xff] }
 0x15a   : > { %953 = vmatprep.subr.mxu0 %v3341_v21  ;;  %1024 = vmatprep.subr.mxu1 %v3557_v54  ;;  %v4773_v21 = vld [vmem:[#allocation23_spill] sm:$0xff] }
 0x15b   : > { %954 = vmatpush1.msra.mxu0 %v3348_v22  ;;  %1025 = vmatpush1.msra.mxu1 %v3563_v55  ;;  %v4774_v22 = vld [vmem:[#allocation14_spill] sm:$0xff] }
 0x15c   : > { %955 = vmatprep.subr.mxu0 %v3355_v23  ;;  %1026 = vmatprep.subr.mxu1 %v3569_v56  ;;  %v4775_v23 = vld [vmem:[#allocation24_spill] sm:$0xff] }
 0x15d   : > { %956 = vmatpush1.msra.mxu0 %v3362_v24  ;;  %1027 = vmatpush1.msra.mxu1 %v3575_v57  ;;  %v4776_v24 = vld [vmem:[#allocation15_spill] sm:$0xff] }
 0x15e   : > { %957 = vmatprep.subr.mxu0 %v3369_v25  ;;  %1028 = vmatprep.subr.mxu1 %v3581_v58  ;;  %v4777_v25 = vld [vmem:[#allocation25_spill] sm:$0xff] }
 0x15f   : > { %958 = vmatpush1.msra.mxu0 %v3376_v26  ;;  %1029 = vmatpush1.msra.mxu1 %v4769_v2  ;;  %v4778_v26 = vld [vmem:[#allocation16_spill] sm:$0xff] }
 0x160   : > { %959 = vmatprep.subr.mxu0 %v4770_v6  ;;  %1030 = vmatprep.subr.mxu1 %v4771_v19 }
 0x161   : > { %960 = vmatpush1.msra.mxu0 %v4772_v20  ;;  %1031 = vmatpush1.msra.mxu1 %v4773_v21 }
 0x162   : > { %961 = vmatprep.subr.mxu0 %v4774_v22  ;;  %1032 = vmatprep.subr.mxu1 %v4775_v23 }
 0x163   : > { %962 = vmatpush1.msra.mxu0 %v4776_v24  ;;  %1033 = vmatpush1.msra.mxu1 %v4777_v25 }
 0x164   : > { %963 = vmatprep.subr.mxu0 %v4778_v26  ;;  %1034 = vmatprep.subr.mxu1 %v4779_v27 }
 0x165   : > { %964 = vmatpush1.msra.mxu0 %v4780_v28  ;;  %1035 = vmatpush1.msra.mxu1 %v4781_v36 }
 0x166   : > { %965 = vmatprep.subr.mxu0 %v4782_v59  ;;  %1036 = vmatprep.subr.mxu1 %v4783_v60 }
 0x167   : > { %966 = vmatpush1.msra.mxu0 %v4784_v35  ;;  %999 = vmatprep.mubr.f32.mxu0 %v4785_v32  ;;  %v2647_v35 = vld [vmem:[%s3206_s26 + $0x38] sm:$0xff] }
 0x168   : > { %1037 = vmatpush1.msra.mxu1 %v4786_v31  ;;  %1070 = vmatprep.mubr.f32.mxu1 %v4785_v32 }
 0x169   : > { %1175 = vmatprep.subr.mxu0 %v4787_v30  ;;  %1246 = vmatprep.subr.mxu1 %v4788_v33 }
 0x208   : > { %v761_v29 = vpop.f32.mrf.mxu0  ;;  %v832_v63 = vpop.f32.mrf.mxu1 }
 0x209   : > { %v837_v6 = vadd.f32 %v2644_v34, %v761_v29  ;;  %v839_v20 = vadd.f32 %v2646_v62, %v832_v63 }
 0x20a   : > { %v763_v22 = vpop.f32.mrf.mxu0  ;;  %v834_v30 = vpop.f32.mrf.mxu1 }
 0x20b   : > { %v2648_v24 = vmul.f32 -1.442695, %v837_v6  ;;  %v2650_v26 = vmul.f32 -1.442695, %v839_v20  ;;  %v838_v28 = vadd.f32 %v2645_v0, %v763_v22  ;;  %v840_v33 = vadd.f32 %v2647_v35, %v834_v30  ;;  %v3937_v35 = vld [vmem:[%s4657_s3 + $0x1e0] sm:$0xff]  ;;  %v3942_v30 = vld [vmem:[%s4657_s3 + $0x1f0] sm:$0xff] }
 0x20d   : > { %2859 = vpow2.f32 %v2648_v24  ;;  %v2649_v59 = vmul.f32 -1.442695, %v838_v28  ;;  %v3925_v28 = vld [vmem:[%s4657_s3 + $0x1e8] sm:$0xff] }
 0x20e   : > { %2861 = vpow2.f32 %v2650_v26  ;;  %4804 = vst [vmem:[#allocation18_spill] sm:$0xff] %v3925_v28 }
 0x20f   : > { %2863 = vpow2.f32 %v2649_v59  ;;  %v3930_v59 = vld [vmem:[%s4657_s3 + $0x1f8] sm:$0xff] }
 0x210   : > { %4805 = vst [vmem:[#allocation19_spill] sm:$0xff] %v3930_v59 }
 0x21a   : > { %v2860_v1 = vpop.eup %2859 }
 0x21b   : > { %v2862_v31 = vpop.eup %2861  ;;  %v844_v60 = vadd.f32 1.0, %v2860_v1 }
 0x21c   : > { %v2864_v36 = vpop.eup %2863  ;;  %v856_v34 = vadd.f32 1.0, %v2862_v31 }
 0x21d   : > { %2865 = vrcp.f32 %v844_v60  ;;  %v850_v27 = vadd.f32 1.0, %v2864_v36 }
 0x21e   : > { %2867 = vtanh.f32 %v840_v33  ;;  %v3949_v33 = vld [vmem:[%s4657_s3 + $0x1c8] sm:$0xff] }
 0x21f   : > { %2869 = vrcp.f32 %v850_v27 }
 0x220   : > { %2871 = vrcp.f32 %v856_v34  ;;  %v3954_v34 = vld [vmem:[%s4657_s3 + $0x1d8] sm:$0xff] }
 0x22a   : > { %v2866_v62 = vpop.eup %2865 }
 0x22b   : > { %v2868_v29 = vpop.eup %2867  ;;  %v860_v0 = vmul.f32 %v2866_v62, %v3679_v61  ;;  %v3961_v62 = vld [vmem:[%s4657_s3 + $0x1c0] sm:$0xff] }
 0x22c   : > { %v2870_v63 = vpop.eup %2869 }
 0x22d   : > { %v861_v6 = vmul.f32 %v2870_v63, %v2868_v29  ;;  %v2872_v22 = vpop.eup %2871  ;;  %v3966_v29 = vld [vmem:[%s4657_s3 + $0x1d0] sm:$0xff]  ;;  %v3973_v63 = vld [vmem:[%s4657_s3 + $0x1a8] sm:$0xff] }
 0x22f   : > { %v3757_v20 = vadd.f32 %v861_v6, %v860_v0  ;;  %v3978_v0 = vld [vmem:[%s4657_s3 + $0x1b8] sm:$0xff]  ;;  %v3985_v6 = vld [vmem:[%s4657_s3 + $0x1a0] sm:$0xff] }
 0x231   : > { %v3760_v24 = vmul.f32 %v2872_v22, %v3757_v20  ;;  %v3997_v22 = vld [vmem:[%s4657_s3 + $0x188] sm:$0xff] }
 0x233   : > { %4789 = vst [vmem:[#allocation21_spill] sm:$0xff] %v3760_v24  ;;  %1000 = vmatmul.mubr.f32.vlgmr.msra.gmra.mxu0 %v3760_v24  ;;  %1071 = vmatmul.mubr.f32.vlgmr.msra.gmra.mxu1 %v3760_v24  ;;  %v4204_v24 = vld [vmem:[%s4657_s3 + $0x30] sm:$0xff] }
 0x234   : > { %1176 = vmatpush1.msra.mxu0 %v3225_v3  ;;  %1247 = vmatpush1.msra.mxu1 %v3448_v37  ;;  %v4790_v3 = vld [vmem:[#allocation26_spill] sm:$0xff]  ;;  %v3879_v37 = vld [vmem:[%s4657_s3 + $0x40] sm:$0xff]  ;;  %4813 = vst [vmem:[#allocation32_spill] sm:$0xff] %v4204_v24 }
 0x235   : > { %1177 = vmatprep.subr.mxu0 %v3230_v4  ;;  %1248 = vmatprep.subr.mxu1 %v3455_v38  ;;  %v4791_v4 = vld [vmem:[#allocation27_spill] sm:$0xff]  ;;  %4798 = vst [vmem:[#allocation14_spill] sm:$0xff] %v3879_v37  ;;  %v3885_v38 = vld [vmem:[%s4657_s3 + $0x28] sm:$0xff] }
 0x236   : > { %1178 = vmatpush1.msra.mxu0 %v3236_v5  ;;  %1249 = vmatpush1.msra.mxu1 %v3463_v39  ;;  %v4792_v5 = vld [vmem:[#allocation28_spill] sm:$0xff]  ;;  %4799 = vst [vmem:[#allocation24_spill] sm:$0xff] %v3885_v38  ;;  %v3891_v39 = vld [vmem:[%s4657_s3 + $0x20] sm:$0xff] }
 0x237   : > { %1179 = vmatprep.subr.mxu0 %v3243_v7  ;;  %1250 = vmatprep.subr.mxu1 %v3469_v40  ;;  %v4793_v7 = vld [vmem:[#allocation29_spill] sm:$0xff]  ;;  %4800 = vst [vmem:[#allocation15_spill] sm:$0xff] %v3891_v39  ;;  %v3897_v40 = vld [vmem:[%s4657_s3 + $0x8] sm:$0xff] }
 0x238   : > { %1180 = vmatpush1.msra.mxu0 %v3250_v8  ;;  %1251 = vmatpush1.msra.mxu1 %v3476_v41  ;;  %v3815_v8 = vld [vmem:[%s4657_s3 + $0xe8] sm:$0xff]  ;;  %4801 = vst [vmem:[#allocation25_spill] sm:$0xff] %v3897_v40  ;;  %v3903_v41 = vld [vmem:[%s4657_s3] sm:$0xff] }
 0x239   : > { %1181 = vmatprep.subr.mxu0 %v3257_v9  ;;  %1252 = vmatprep.subr.mxu1 %v3483_v42  ;;  %v3820_v9 = vld [vmem:[%s4657_s3 + $0xe0] sm:$0xff]  ;;  %4802 = vst [vmem:[#allocation16_spill] sm:$0xff] %v3903_v41 }
 0x23a   : > { %1182 = vmatpush1.msra.mxu0 %v3264_v10  ;;  %1253 = vmatpush1.msra.mxu1 %v3490_v43  ;;  %v3825_v10 = vld [vmem:[%s4657_s3 + $0xc8] sm:$0xff]  ;;  %v2651_v42 = vld [vmem:[%s3206_s26 + $0x40] sm:$0xff]  ;;  %v2653_v43 = vld [vmem:[%s3206_s26 + $0x50] sm:$0xff] }
 0x23b   : > { %1183 = vmatprep.subr.mxu0 %v3271_v11  ;;  %1254 = vmatprep.subr.mxu1 %v3497_v44  ;;  %v3831_v11 = vld [vmem:[%s4657_s3 + $0xc0] sm:$0xff] }
 0x23c   : > { %1184 = vmatpush1.msra.mxu0 %v3278_v12  ;;  %1255 = vmatpush1.msra.mxu1 %v3503_v45  ;;  %v3837_v12 = vld [vmem:[%s4657_s3 + $0xa8] sm:$0xff] }
 0x23d   : > { %1185 = vmatprep.subr.mxu0 %v3285_v13  ;;  %1256 = vmatprep.subr.mxu1 %v3509_v46  ;;  %v3843_v13 = vld [vmem:[%s4657_s3 + $0xa0] sm:$0xff]  ;;  %v2652_v46 = vld [vmem:[%s3206_s26 + $0x48] sm:$0xff] }
 0x23e   : > { %1186 = vmatpush1.msra.mxu0 %v3292_v14  ;;  %1257 = vmatpush1.msra.mxu1 %v3515_v47  ;;  %v3849_v14 = vld [vmem:[%s4657_s3 + $0x88] sm:$0xff] }
 0x23f   : > { %1187 = vmatprep.subr.mxu0 %v3299_v15  ;;  %1258 = vmatprep.subr.mxu1 %v3521_v48  ;;  %v3855_v15 = vld [vmem:[%s4657_s3 + $0x80] sm:$0xff] }
 0x240   : > { %1188 = vmatpush1.msra.mxu0 %v3306_v16  ;;  %1259 = vmatpush1.msra.mxu1 %v3527_v49  ;;  %4794 = vst [vmem:[#allocation12_spill] sm:$0xff] %v3855_v15  ;;  %v3861_v16 = vld [vmem:[%s4657_s3 + $0x68] sm:$0xff] }
 0x241   : > { %1189 = vmatprep.subr.mxu0 %v3313_v17  ;;  %1260 = vmatprep.subr.mxu1 %v3533_v50  ;;  %4795 = vst [vmem:[#allocation22_spill] sm:$0xff] %v3861_v16  ;;  %v3867_v17 = vld [vmem:[%s4657_s3 + $0x60] sm:$0xff] }
 0x242   : > { %1190 = vmatpush1.msra.mxu0 %v3320_v18  ;;  %1261 = vmatpush1.msra.mxu1 %v3539_v51  ;;  %4796 = vst [vmem:[#allocation13_spill] sm:$0xff] %v3867_v17  ;;  %v3873_v18 = vld [vmem:[%s4657_s3 + $0x48] sm:$0xff] }
 0x243   : > { %1262 = vmatprep.subr.mxu1 %v3545_v52  ;;  %1239 = vmatprep.mubr.f32.mxu0 %v4785_v32  ;;  %4797 = vst [vmem:[#allocation23_spill] sm:$0xff] %v3873_v18 }
 0x244   : > { %1263 = vmatpush1.msra.mxu1 %v3551_v53  ;;  %1310 = vmatprep.mubr.f32.mxu1 %v4785_v32 }
 0x245   : > { %1264 = vmatprep.subr.mxu1 %v3557_v54  ;;  %1191 = vmatprep.subr.mxu0 %v3815_v8  ;;  %v2654_v54 = vld [vmem:[%s3206_s26 + $0x58] sm:$0xff] }
 0x246   : > { %1265 = vmatpush1.msra.mxu1 %v3563_v55  ;;  %1192 = vmatpush1.msra.mxu0 %v3820_v9 }
 0x247   : > { %1266 = vmatprep.subr.mxu1 %v3569_v56  ;;  %1193 = vmatprep.subr.mxu0 %v3825_v10 }
 0x248   : > { %1267 = vmatpush1.msra.mxu1 %v3575_v57  ;;  %1194 = vmatpush1.msra.mxu0 %v3831_v11 }
 0x249   : > { %1268 = vmatprep.subr.mxu1 %v3581_v58  ;;  %1195 = vmatprep.subr.mxu0 %v3837_v12 }
 0x24a   : > { %1269 = vmatpush1.msra.mxu1 %v4769_v2  ;;  %1196 = vmatpush1.msra.mxu0 %v3843_v13 }
 0x24b   : > { %1270 = vmatprep.subr.mxu1 %v4771_v19  ;;  %1197 = vmatprep.subr.mxu0 %v3849_v14 }
 0x24c   : > { %1271 = vmatpush1.msra.mxu1 %v4773_v21  ;;  %1198 = vmatpush1.msra.mxu0 %v3855_v15 }
 0x24d   : > { %1272 = vmatprep.subr.mxu1 %v4775_v23  ;;  %1199 = vmatprep.subr.mxu0 %v3861_v16 }
 0x24e   : > { %1273 = vmatpush1.msra.mxu1 %v4777_v25  ;;  %1200 = vmatpush1.msra.mxu0 %v3867_v17 }
 0x24f   : > { %1274 = vmatprep.subr.mxu1 %v4790_v3  ;;  %1201 = vmatprep.subr.mxu0 %v3873_v18  ;;  %v4002_v3 = vld [vmem:[%s4657_s3 + $0x198] sm:$0xff] }
 0x250   : > { %1275 = vmatpush1.msra.mxu1 %v4791_v4  ;;  %1202 = vmatpush1.msra.mxu0 %v3879_v37  ;;  %v4009_v4 = vld [vmem:[%s4657_s3 + $0x180] sm:$0xff] }
 0x251   : > { %1276 = vmatprep.subr.mxu1 %v4792_v5  ;;  %1203 = vmatprep.subr.mxu0 %v3885_v38  ;;  %v4014_v5 = vld [vmem:[%s4657_s3 + $0x190] sm:$0xff] }
 0x252   : > { %1277 = vmatpush1.msra.mxu1 %v4793_v7  ;;  %1204 = vmatpush1.msra.mxu0 %v3891_v39  ;;  %v4021_v7 = vld [vmem:[%s4657_s3 + $0x168] sm:$0xff] }
 0x253   : > { %1205 = vmatprep.subr.mxu0 %v3897_v40  ;;  %1486 = vmatprep.subr.mxu1 %v3930_v59 }
 0x254   : > { %1206 = vmatpush1.msra.mxu0 %v3903_v41 }
 0x255   : > { %1415 = vmatprep.subr.mxu0 %v3925_v28 }
 0x2f3   : > { %v1001_v44 = vpop.f32.mrf.mxu0  ;;  %v1072_v45 = vpop.f32.mrf.mxu1 }
 0x2f4   : > { %v1077_v47 = vadd.f32 %v2651_v42, %v1001_v44  ;;  %v1079_v48 = vadd.f32 %v2653_v43, %v1072_v45  ;;  %v4026_v42 = vld [vmem:[%s4657_s3 + $0x178] sm:$0xff]  ;;  %v4033_v43 = vld [vmem:[%s4657_s3 + $0x160] sm:$0xff]  ;;  %v4038_v44 = vld [vmem:[%s4657_s3 + $0x170] sm:$0xff] }
 0x2f5   : > { %v1003_v49 = vpop.f32.mrf.mxu0  ;;  %v1074_v55 = vpop.f32.mrf.mxu1  ;;  %v4045_v45 = vld [vmem:[%s4657_s3 + $0x148] sm:$0xff] }
 0x2f6   : > { %v2655_v50 = vmul.f32 -1.442695, %v1077_v47  ;;  %v2657_v51 = vmul.f32 -1.442695, %v1079_v48  ;;  %v1078_v52 = vadd.f32 %v2652_v46, %v1003_v49  ;;  %v1080_v57 = vadd.f32 %v2654_v54, %v1074_v55  ;;  %v4050_v46 = vld [vmem:[%s4657_s3 + $0x158] sm:$0xff]  ;;  %v4055_v47 = vld [vmem:[%s4657_s3 + $0x140] sm:$0xff] }
 0x2f7   : > { %v4062_v48 = vld [vmem:[%s4657_s3 + $0x150] sm:$0xff]  ;;  %v4067_v49 = vld [vmem:[%s4657_s3 + $0x128] sm:$0xff]  ;;  %v4096_v54 = vld [vmem:[%s4657_s3 + $0x118] sm:$0xff] }
 0x2f8   : > { %2873 = vpow2.f32 %v2655_v50  ;;  %v2656_v53 = vmul.f32 -1.442695, %v1078_v52  ;;  %v4072_v50 = vld [vmem:[%s4657_s3 + $0x138] sm:$0xff]  ;;  %v4084_v52 = vld [vmem:[%s4657_s3 + $0x130] sm:$0xff]  ;;  %v4101_v55 = vld [vmem:[%s4657_s3 + $0x100] sm:$0xff] }
 0x2f9   : > { %2875 = vpow2.f32 %v2657_v51  ;;  %v4079_v51 = vld [vmem:[%s4657_s3 + $0x120] sm:$0xff] }
 0x2fa   : > { %2877 = vpow2.f32 %v2656_v53  ;;  %v4089_v53 = vld [vmem:[%s4657_s3 + $0x108] sm:$0xff] }
 0x305   : > { %v2874_v56 = vpop.eup %2873 }
 0x306   : > { %v2876_v58 = vpop.eup %2875  ;;  %v1084_v61 = vadd.f32 1.0, %v2874_v56  ;;  %v4106_v56 = vld [vmem:[%s4657_s3 + $0x110] sm:$0xff] }
 0x307   : > { %v2878_v1 = vpop.eup %2877  ;;  %v1096_v19 = vadd.f32 1.0, %v2876_v58  ;;  %v4120_v58 = vld [vmem:[%s4657_s3 + $0xf0] sm:$0xff] }
 0x308   : > { %2879 = vrcp.f32 %v1084_v61  ;;  %v1090_v2 = vadd.f32 1.0, %v2878_v1  ;;  %v4127_v61 = vld [vmem:[%s4657_s3 + $0xd8] sm:$0xff]  ;;  %v4134_v1 = vld [vmem:[%s4657_s3 + $0xd0] sm:$0xff] }
 0x309   : > { %2881 = vtanh.f32 %v1080_v57  ;;  %v4113_v57 = vld [vmem:[%s4657_s3 + $0xf8] sm:$0xff] }
 0x30a   : > { %2883 = vrcp.f32 %v1090_v2  ;;  %v4141_v2 = vld [vmem:[%s4657_s3 + $0xb8] sm:$0xff] }
 0x30b   : > { %2885 = vrcp.f32 %v1096_v19  ;;  %v4148_v19 = vld [vmem:[%s4657_s3 + $0xb0] sm:$0xff] }
 0x315   : > { %v2880_v21 = vpop.eup %2879 }
 0x316   : > { %v2882_v23 = vpop.eup %2881  ;;  %v1100_v27 = vmul.f32 %v2880_v21, %v3757_v20  ;;  %v3990_v20 = vld [vmem:[%s4657_s3 + $0x1b0] sm:$0xff]  ;;  %v4155_v21 = vld [vmem:[%s4657_s3 + $0x98] sm:$0xff] }
 0x317   : > { %v2884_v25 = vpop.eup %2883  ;;  %4806 = vst [vmem:[#allocation11_spill] sm:$0xff] %v4155_v21 }
 0x318   : > { %v1101_v36 = vmul.f32 %v2884_v25, %v2882_v23  ;;  %v2886_v31 = vpop.eup %2885  ;;  %v4162_v23 = vld [vmem:[%s4657_s3 + $0x90] sm:$0xff]  ;;  %v4169_v25 = vld [vmem:[%s4657_s3 + $0x78] sm:$0xff] }
 0x319   : > { %4807 = vst [vmem:[#allocation20_spill] sm:$0xff] %v4162_v23  ;;  %4808 = vst [vmem:[#allocation26_spill] sm:$0xff] %v4169_v25 }
 0x31a   : > { %v3913_v60 = vadd.f32 %v1101_v36, %v1100_v27  ;;  %v4176_v27 = vld [vmem:[%s4657_s3 + $0x70] sm:$0xff]  ;;  %v4183_v36 = vld [vmem:[%s4657_s3 + $0x58] sm:$0xff] }
 0x31b   : > { %4809 = vst [vmem:[#allocation27_spill] sm:$0xff] %v4176_v27  ;;  %4810 = vst [vmem:[#allocation28_spill] sm:$0xff] %v4183_v36 }
 0x31c   : > { %v3916_v26 = vmul.f32 %v2886_v31, %v3913_v60  ;;  %v4190_v31 = vld [vmem:[%s4657_s3 + $0x50] sm:$0xff] }
 0x31d   : > { %4811 = vst [vmem:[#allocation29_spill] sm:$0xff] %v4190_v31 }
 0x31e   : > { %4803 = vst [vmem:[#allocation17_spill] sm:$0xff] %v3916_v26  ;;  %1240 = vmatmul.mubr.f32.vlgmr.msra.gmra.mxu0 %v3916_v26  ;;  %1311 = vmatmul.mubr.f32.vlgmr.msra.gmra.mxu1 %v3916_v26  ;;  %v4197_v26 = vld [vmem:[%s4657_s3 + $0x38] sm:$0xff] }
 0x31f   : > { %1479 = vmatprep.mubr.f32.mxu0 %v4785_v32  ;;  %1550 = vmatprep.mubr.f32.mxu1 %v4785_v32  ;;  %4812 = vst [vmem:[#allocation31_spill] sm:$0xff] %v4197_v26  ;;  %v4211_v32 = vld [vmem:[%s4657_s3 + $0x18] sm:$0xff] }
 0x320   : > { %1416 = vmatpush1.msra.mxu0 %v3937_v35  ;;  %1487 = vmatpush1.msra.mxu1 %v3942_v30  ;;  %4814 = vst [vmem:[#allocation33_spill] sm:$0xff] %v4211_v32 }
 0x321   : > { %1417 = vmatprep.subr.mxu0 %v3949_v33  ;;  %1488 = vmatprep.subr.mxu1 %v3954_v34 }
 0x322   : > { %1418 = vmatpush1.msra.mxu0 %v3961_v62  ;;  %1489 = vmatpush1.msra.mxu1 %v3966_v29 }
 0x323   : > { %1419 = vmatprep.subr.mxu0 %v3973_v63  ;;  %1490 = vmatprep.subr.mxu1 %v3978_v0 }
 0x324   : > { %1420 = vmatpush1.msra.mxu0 %v3985_v6  ;;  %1491 = vmatpush1.msra.mxu1 %v3990_v20 }
 0x325   : > { %1421 = vmatprep.subr.mxu0 %v3997_v22  ;;  %1492 = vmatprep.subr.mxu1 %v4002_v3 }
 0x326   : > { %1422 = vmatpush1.msra.mxu0 %v4009_v4  ;;  %1493 = vmatpush1.msra.mxu1 %v4014_v5 }
 0x327   : > { %1423 = vmatprep.subr.mxu0 %v4021_v7  ;;  %1494 = vmatprep.subr.mxu1 %v4026_v42 }
 0x328   : > { %1424 = vmatpush1.msra.mxu0 %v4033_v43  ;;  %1495 = vmatpush1.msra.mxu1 %v4038_v44 }
 0x329   : > { %1425 = vmatprep.subr.mxu0 %v4045_v45  ;;  %1496 = vmatprep.subr.mxu1 %v4050_v46 }
 0x32a   : > { %1426 = vmatpush1.msra.mxu0 %v4055_v47  ;;  %1497 = vmatpush1.msra.mxu1 %v4062_v48 }
 0x32b   : > { %1427 = vmatprep.subr.mxu0 %v4067_v49  ;;  %1498 = vmatprep.subr.mxu1 %v4072_v50 }
 0x32c   : > { %1428 = vmatpush1.msra.mxu0 %v4079_v51  ;;  %1499 = vmatpush1.msra.mxu1 %v4084_v52 }
 0x32d   : > { %1429 = vmatprep.subr.mxu0 %v4089_v53  ;;  %1500 = vmatprep.subr.mxu1 %v4096_v54 }
 0x32e   : > { %1430 = vmatpush1.msra.mxu0 %v4101_v55  ;;  %1501 = vmatpush1.msra.mxu1 %v4106_v56 }
 0x32f   : > { %1431 = vmatprep.subr.mxu0 %v3815_v8  ;;  %1502 = vmatprep.subr.mxu1 %v4113_v57 }
 0x330   : > { %1432 = vmatpush1.msra.mxu0 %v3820_v9  ;;  %1503 = vmatpush1.msra.mxu1 %v4120_v58 }
 0x331   : > { %1433 = vmatprep.subr.mxu0 %v3825_v10  ;;  %1504 = vmatprep.subr.mxu1 %v4127_v61 }
 0x332   : > { %1434 = vmatpush1.msra.mxu0 %v3831_v11  ;;  %1505 = vmatpush1.msra.mxu1 %v4134_v1 }
 0x333   : > { %1435 = vmatprep.subr.mxu0 %v3837_v12  ;;  %1506 = vmatprep.subr.mxu1 %v4141_v2 }
 0x334   : > { %1436 = vmatpush1.msra.mxu0 %v3843_v13  ;;  %1507 = vmatpush1.msra.mxu1 %v4148_v19 }
 0x335   : > { %1437 = vmatprep.subr.mxu0 %v3849_v14  ;;  %1508 = vmatprep.subr.mxu1 %v4155_v21 }
 0x336   : > { %1438 = vmatpush1.msra.mxu0 %v3855_v15  ;;  %1509 = vmatpush1.msra.mxu1 %v4162_v23 }
 0x337   : > { %1439 = vmatprep.subr.mxu0 %v3861_v16  ;;  %1510 = vmatprep.subr.mxu1 %v4169_v25 }
 0x338   : > { %1440 = vmatpush1.msra.mxu0 %v3867_v17  ;;  %1511 = vmatpush1.msra.mxu1 %v4176_v27 }
 0x339   : > { %1441 = vmatprep.subr.mxu0 %v3873_v18  ;;  %1512 = vmatprep.subr.mxu1 %v4183_v36  ;;  %v4218_v36 = vld [vmem:[%s4657_s3 + $0x10] sm:$0xff] }
 0x33a   : > { %1442 = vmatpush1.msra.mxu0 %v3879_v37  ;;  %1513 = vmatpush1.msra.mxu1 %v4190_v31  ;;  %4815 = vst [vmem:[#allocation34_spill] sm:$0xff] %v4218_v36 }
 0x33b   : > { %1443 = vmatprep.subr.mxu0 %v3885_v38  ;;  %1514 = vmatprep.subr.mxu1 %v4197_v26  ;;  %v2658_v26 = vld [vmem:[%s3206_s26 + $0x60] sm:$0xff]  ;;  %v2660_v38 = vld [vmem:[%s3206_s26 + $0x70] sm:$0xff] }
 0x33c   : > { %1444 = vmatpush1.msra.mxu0 %v3891_v39  ;;  %1515 = vmatpush1.msra.mxu1 %v4204_v24  ;;  %v2659_v39 = vld [vmem:[%s3206_s26 + $0x68] sm:$0xff] }
 0x33d   : > { %1445 = vmatprep.subr.mxu0 %v3897_v40  ;;  %1516 = vmatprep.subr.mxu1 %v4211_v32 }
 0x33e   : > { %1446 = vmatpush1.msra.mxu0 %v3903_v41  ;;  %1517 = vmatpush1.msra.mxu1 %v4218_v36  ;;  %v2661_v36 = vld [vmem:[%s3206_s26 + $0x78] sm:$0xff] }
 0x33f   : > { %1655 = vmatprep.subr.mxu0 %v3925_v28  ;;  %1726 = vmatprep.subr.mxu1 %v3930_v59 }
 0x3de   : > { %v1241_v31 = vpop.f32.mrf.mxu0  ;;  %v1312_v37 = vpop.f32.mrf.mxu1 }
 0x3df   : > { %v1317_v18 = vadd.f32 %v2658_v26, %v1241_v31  ;;  %v1319_v24 = vadd.f32 %v2660_v38, %v1312_v37  ;;  %v4828_v31 = vld [vmem:[#allocation24_spill] sm:$0xff] }
 0x3e0   : > { %v1243_v27 = vpop.f32.mrf.mxu0  ;;  %v1314_v28 = vpop.f32.mrf.mxu1 }
 0x3e1   : > { %v2662_v40 = vmul.f32 -1.442695, %v1317_v18  ;;  %v2664_v17 = vmul.f32 -1.442695, %v1319_v24  ;;  %v1318_v32 = vadd.f32 %v2659_v39, %v1243_v27  ;;  %v1320_v59 = vadd.f32 %v2661_v36, %v1314_v28  ;;  %v4821_v28 = vld [vmem:[#allocation26_spill] sm:$0xff]  ;;  %v4827_v36 = vld [vmem:[#allocation29_spill] sm:$0xff] }
 0x3e2   : > { %v4826_v27 = vld [vmem:[#allocation14_spill] sm:$0xff] }
 0x3e3   : > { %2887 = vpow2.f32 %v2662_v40  ;;  %v2663_v41 = vmul.f32 -1.442695, %v1318_v32 }
 0x3e4   : > { %2889 = vpow2.f32 %v2664_v17 }
 0x3e5   : > { %2891 = vpow2.f32 %v2663_v41  ;;  %v4819_v41 = vld [vmem:[#allocation20_spill] sm:$0xff] }
 0x3f0   : > { %v2888_v25 = vpop.eup %2887 }
 0x3f1   : > { %v2890_v16 = vpop.eup %2889  ;;  %v1324_v23 = vadd.f32 1.0, %v2888_v25  ;;  %v4825_v25 = vld [vmem:[#allocation28_spill] sm:$0xff] }
 0x3f2   : > { %v2892_v15 = vpop.eup %2891  ;;  %v1336_v26 = vadd.f32 1.0, %v2890_v16  ;;  %v4818_v16 = vld [vmem:[#allocation12_spill] sm:$0xff] }
 0x3f3   : > { %2893 = vrcp.f32 %v1324_v23  ;;  %v1330_v21 = vadd.f32 1.0, %v2892_v15  ;;  %v4817_v15 = vld [vmem:[#allocation11_spill] sm:$0xff] }
 0x3f4   : > { %2895 = vtanh.f32 %v1320_v59  ;;  %v4822_v59 = vld [vmem:[#allocation13_spill] sm:$0xff]  ;;  %v4824_v23 = vld [vmem:[#allocation23_spill] sm:$0xff] }
 0x3f5   : > { %2897 = vrcp.f32 %v1330_v21  ;;  %v4823_v21 = vld [vmem:[#allocation27_spill] sm:$0xff] }
 0x3f6   : > { %2899 = vrcp.f32 %v1336_v26  ;;  %v4829_v26 = vld [vmem:[#allocation31_spill] sm:$0xff] }
 0x400   : > { %v2894_v18 = vpop.eup %2893 }
 0x401   : > { %v2896_v24 = vpop.eup %2895  ;;  %v1340_v32 = vmul.f32 %v2894_v18, %v3913_v60  ;;  %v4820_v60 = vld [vmem:[#allocation22_spill] sm:$0xff]  ;;  %v4830_v18 = vld [vmem:[#allocation15_spill] sm:$0xff] }
 0x402   : > { %v2898_v37 = vpop.eup %2897 }
 0x403   : > { %v1341_v17 = vmul.f32 %v2898_v37, %v2896_v24  ;;  %v2900_v39 = vpop.eup %2899  ;;  %v4831_v24 = vld [vmem:[#allocation32_spill] sm:$0xff]  ;;  %v4832_v37 = vld [vmem:[#allocation25_spill] sm:$0xff] }
 0x405   : > { %v4233_v38 = vadd.f32 %v1341_v17, %v1340_v32  ;;  %v4833_v32 = vld [vmem:[#allocation33_spill] sm:$0xff]  ;;  %v4834_v17 = vld [vmem:[#allocation16_spill] sm:$0xff] }
 0x407   : > { %v4236_v40 = vmul.f32 %v2900_v39, %v4233_v38  ;;  %v4835_v39 = vmov 0.0  }
 0x409   : > { %4816 = vst [vmem:[#allocation35_spill] sm:$0xff] %v4236_v40  ;;  %1480 = vmatmul.mubr.f32.vlgmr.msra.gmra.mxu0 %v4236_v40  ;;  %1551 = vmatmul.mubr.f32.vlgmr.msra.gmra.mxu1 %v4236_v40  ;;  %v4836_v40 = vld [vmem:[#allocation34_spill] sm:$0xff] }
 0x40a   : > { %1656 = vmatpush1.msra.mxu0 %v3937_v35  ;;  %1727 = vmatpush1.msra.mxu1 %v3942_v30 }
 0x40b   : > { %1657 = vmatprep.subr.mxu0 %v3949_v33  ;;  %1728 = vmatprep.subr.mxu1 %v3954_v34 }
 0x40c   : > { %1658 = vmatpush1.msra.mxu0 %v3961_v62  ;;  %1729 = vmatpush1.msra.mxu1 %v3966_v29 }
 0x40d   : > { %1659 = vmatprep.subr.mxu0 %v3973_v63  ;;  %1730 = vmatprep.subr.mxu1 %v3978_v0 }
 0x40e   : > { %1660 = vmatpush1.msra.mxu0 %v3985_v6  ;;  %1731 = vmatpush1.msra.mxu1 %v3990_v20 }
 0x40f   : > { %1661 = vmatprep.subr.mxu0 %v3997_v22  ;;  %1732 = vmatprep.subr.mxu1 %v4002_v3 }
 0x410   : > { %1662 = vmatpush1.msra.mxu0 %v4009_v4  ;;  %1733 = vmatpush1.msra.mxu1 %v4014_v5 }
 0x411   : > { %1663 = vmatprep.subr.mxu0 %v4021_v7  ;;  %1734 = vmatprep.subr.mxu1 %v4026_v42 }
 0x412   : > { %1664 = vmatpush1.msra.mxu0 %v4033_v43  ;;  %1735 = vmatpush1.msra.mxu1 %v4038_v44 }
 0x413   : > { %1665 = vmatprep.subr.mxu0 %v4045_v45  ;;  %1736 = vmatprep.subr.mxu1 %v4050_v46 }
 0x414   : > { %1666 = vmatpush1.msra.mxu0 %v4055_v47  ;;  %1737 = vmatpush1.msra.mxu1 %v4062_v48 }
 0x415   : > { %1667 = vmatprep.subr.mxu0 %v4067_v49  ;;  %1738 = vmatprep.subr.mxu1 %v4072_v50 }
 0x416   : > { %1668 = vmatpush1.msra.mxu0 %v4079_v51  ;;  %1739 = vmatpush1.msra.mxu1 %v4084_v52 }
 0x417   : > { %1669 = vmatprep.subr.mxu0 %v4089_v53  ;;  %1740 = vmatprep.subr.mxu1 %v4096_v54 }
 0x418   : > { %1670 = vmatpush1.msra.mxu0 %v4101_v55  ;;  %1741 = vmatpush1.msra.mxu1 %v4106_v56 }
 0x419   : > { %1671 = vmatprep.subr.mxu0 %v3815_v8  ;;  %1742 = vmatprep.subr.mxu1 %v4113_v57 }
 0x41a   : > { %1672 = vmatpush1.msra.mxu0 %v3820_v9  ;;  %1743 = vmatpush1.msra.mxu1 %v4120_v58 }
 0x41b   : > { %1673 = vmatprep.subr.mxu0 %v3825_v10  ;;  %1744 = vmatprep.subr.mxu1 %v4127_v61 }
 0x41c   : > { %1674 = vmatpush1.msra.mxu0 %v3831_v11  ;;  %1745 = vmatpush1.msra.mxu1 %v4134_v1 }
 0x41d   : > { %1675 = vmatprep.subr.mxu0 %v3837_v12  ;;  %1746 = vmatprep.subr.mxu1 %v4141_v2 }
 0x41e   : > { %1676 = vmatpush1.msra.mxu0 %v3843_v13  ;;  %1747 = vmatpush1.msra.mxu1 %v4148_v19 }
 0x41f   : > { %1677 = vmatprep.subr.mxu0 %v3849_v14  ;;  %1748 = vmatprep.subr.mxu1 %v4817_v15 }
 0x420   : > { %1678 = vmatpush1.msra.mxu0 %v4818_v16  ;;  %1749 = vmatpush1.msra.mxu1 %v4819_v41 }
 0x421   : > { %1679 = vmatprep.subr.mxu0 %v4820_v60  ;;  %1750 = vmatprep.subr.mxu1 %v4821_v28 }
 0x422   : > { %1680 = vmatpush1.msra.mxu0 %v4822_v59  ;;  %1751 = vmatpush1.msra.mxu1 %v4823_v21 }
 0x423   : > { %1681 = vmatprep.subr.mxu0 %v4824_v23  ;;  %1752 = vmatprep.subr.mxu1 %v4825_v25 }
 0x424   : > { %1682 = vmatpush1.msra.mxu0 %v4826_v27  ;;  %1753 = vmatpush1.msra.mxu1 %v4827_v36  ;;  %v4838_v36 = vld [vmem:[#allocation19_spill] sm:$0xff] }
 0x425   : > { %1683 = vmatprep.subr.mxu0 %v4828_v31  ;;  %1754 = vmatprep.subr.mxu1 %v4829_v26  ;;  %v4837_v31 = vld [vmem:[#allocation18_spill] sm:$0xff]  ;;  %v2667_v26 = vld [vmem:[%s3206_s26 + $0x90] sm:$0xff] }
 0x426   : > { %1684 = vmatpush1.msra.mxu0 %v4830_v18  ;;  %1755 = vmatpush1.msra.mxu1 %v4831_v24  ;;  %v2665_v18 = vld [vmem:[%s3206_s26 + $0x80] sm:$0xff] }
 0x427   : > { %1685 = vmatprep.subr.mxu0 %v4832_v37  ;;  %1756 = vmatprep.subr.mxu1 %v4833_v32  ;;  %v2666_v37 = vld [vmem:[%s3206_s26 + $0x88] sm:$0xff] }
 0x428   : > { %1686 = vmatpush1.msra.mxu0 %v4834_v17  ;;  %1719 = vmatprep.mubr.f32.mxu0 %v4835_v39 }
 0x429   : > { %1757 = vmatpush1.msra.mxu1 %v4836_v40  ;;  %1790 = vmatprep.mubr.f32.mxu1 %v4835_v39  ;;  %v2668_v39 = vld [vmem:[%s3206_s26 + $0x98] sm:$0xff] }
 0x42a   : > { %1895 = vmatprep.subr.mxu0 %v4837_v31  ;;  %1966 = vmatprep.subr.mxu1 %v4838_v36 }
 0x4c9   : > { %v1481_v24 = vpop.f32.mrf.mxu0  ;;  %v1552_v27 = vpop.f32.mrf.mxu1 }
 0x4ca   : > { %v1557_v25 = vadd.f32 %v2665_v18, %v1481_v24  ;;  %v1559_v32 = vadd.f32 %v2667_v26, %v1552_v27  ;;  %v4854_v24 = vld [vmem:[#allocation32_spill] sm:$0xff] }
 0x4cb   : > { %v1483_v23 = vpop.f32.mrf.mxu0  ;;  %v1554_v31 = vpop.f32.mrf.mxu1 }
 0x4cc   : > { %v2669_v17 = vmul.f32 -1.442695, %v1557_v25  ;;  %v2671_v21 = vmul.f32 -1.442695, %v1559_v32  ;;  %v1558_v59 = vadd.f32 %v2666_v37, %v1483_v23  ;;  %v1560_v36 = vadd.f32 %v2668_v39, %v1554_v31  ;;  %v4855_v37 = vld [vmem:[#allocation25_spill] sm:$0xff] }
 0x4cd   : > { %v4856_v32 = vld [vmem:[#allocation33_spill] sm:$0xff]  ;;  %v4858_v39 = vmov 0.0  }
 0x4ce   : > { %2901 = vpow2.f32 %v2669_v17  ;;  %v2670_v40 = vmul.f32 -1.442695, %v1558_v59  ;;  %v4857_v17 = vld [vmem:[#allocation16_spill] sm:$0xff] }
 0x4cf   : > { %2903 = vpow2.f32 %v2671_v21 }
 0x4d0   : > { %2905 = vpow2.f32 %v2670_v40 }
 0x4db   : > { %v2902_v28 = vpop.eup %2901 }
 0x4dc   : > { %v2904_v60 = vpop.eup %2903  ;;  %v1564_v41 = vadd.f32 1.0, %v2902_v28  ;;  %v4852_v28 = vld [vmem:[#allocation31_spill] sm:$0xff] }
 0x4dd   : > { %v2906_v16 = vpop.eup %2905  ;;  %v1576_v18 = vadd.f32 1.0, %v2904_v60  ;;  %v4851_v60 = vld [vmem:[#allocation24_spill] sm:$0xff] }
 0x4de   : > { %2907 = vrcp.f32 %v1564_v41  ;;  %v1570_v15 = vadd.f32 1.0, %v2906_v16  ;;  %v4847_v16 = vld [vmem:[#allocation23_spill] sm:$0xff]  ;;  %v4850_v41 = vld [vmem:[#allocation29_spill] sm:$0xff] }
 0x4df   : > { %2909 = vtanh.f32 %v1560_v36  ;;  %v4853_v36 = vld [vmem:[#allocation15_spill] sm:$0xff] }
 0x4e0   : > { %2911 = vrcp.f32 %v1570_v15  ;;  %v4845_v15 = vld [vmem:[#allocation13_spill] sm:$0xff] }
 0x4e1   : > { %2913 = vrcp.f32 %v1576_v18  ;;  %v4859_v18 = vld [vmem:[#allocation34_spill] sm:$0xff] }
 0x4eb   : > { %v2908_v25 = vpop.eup %2907 }
 0x4ec   : > { %v2910_v27 = vpop.eup %2909  ;;  %v1580_v59 = vmul.f32 %v2908_v25, %v4233_v38  ;;  %v4843_v38 = vld [vmem:[#allocation22_spill] sm:$0xff] }
 0x4ed   : > { %v2912_v23 = vpop.eup %2911  ;;  %v4860_v25 = vld [vmem:[#allocation18_spill] sm:$0xff] }
 0x4ee   : > { %v1581_v21 = vmul.f32 %v2912_v23, %v2910_v27  ;;  %v2914_v26 = vpop.eup %2913  ;;  %v4861_v27 = vld [vmem:[#allocation19_spill] sm:$0xff]  ;;  %v2672_v23 = vld [vmem:[%s3206_s26 + $0xa0] sm:$0xff] }
 0x4f0   : > { %v4311_v40 = vadd.f32 %v1581_v21, %v1580_v59  ;;  %v2674_v59 = vld [vmem:[%s3206_s26 + $0xb0] sm:$0xff] }
 0x4f2   : > { %v4314_v31 = vmul.f32 %v2914_v26, %v4311_v40 }
 0x4f4   : > { %4839 = vst [vmem:[#allocation36_spill] sm:$0xff] %v4314_v31  ;;  %1720 = vmatmul.mubr.f32.vlgmr.msra.gmra.mxu0 %v4314_v31  ;;  %1791 = vmatmul.mubr.f32.vlgmr.msra.gmra.mxu1 %v4314_v31 }
 0x4f5   : > { %1896 = vmatpush1.msra.mxu0 %v3937_v35  ;;  %1967 = vmatpush1.msra.mxu1 %v3942_v30 }
 0x4f6   : > { %1897 = vmatprep.subr.mxu0 %v3949_v33  ;;  %1968 = vmatprep.subr.mxu1 %v3954_v34 }
 0x4f7   : > { %1898 = vmatpush1.msra.mxu0 %v3961_v62  ;;  %1969 = vmatpush1.msra.mxu1 %v3966_v29 }
 0x4f8   : > { %1899 = vmatprep.subr.mxu0 %v3973_v63  ;;  %1970 = vmatprep.subr.mxu1 %v3978_v0 }
 0x4f9   : > { %1900 = vmatpush1.msra.mxu0 %v3985_v6  ;;  %1971 = vmatpush1.msra.mxu1 %v3990_v20 }
 0x4fa   : > { %1901 = vmatprep.subr.mxu0 %v3997_v22  ;;  %1972 = vmatprep.subr.mxu1 %v4002_v3 }
 0x4fb   : > { %1902 = vmatpush1.msra.mxu0 %v4009_v4  ;;  %1973 = vmatpush1.msra.mxu1 %v4014_v5 }
 0x4fc   : > { %1903 = vmatprep.subr.mxu0 %v4021_v7  ;;  %1974 = vmatprep.subr.mxu1 %v4026_v42 }
 0x4fd   : > { %1904 = vmatpush1.msra.mxu0 %v4033_v43  ;;  %1975 = vmatpush1.msra.mxu1 %v4038_v44 }
 0x4fe   : > { %1905 = vmatprep.subr.mxu0 %v4045_v45  ;;  %1976 = vmatprep.subr.mxu1 %v4050_v46 }
 0x4ff   : > { %1906 = vmatpush1.msra.mxu0 %v4055_v47  ;;  %1977 = vmatpush1.msra.mxu1 %v4062_v48 }
 0x500   : > { %1907 = vmatprep.subr.mxu0 %v4067_v49  ;;  %1978 = vmatprep.subr.mxu1 %v4072_v50 }
 0x501   : > { %1908 = vmatpush1.msra.mxu0 %v4079_v51  ;;  %1979 = vmatpush1.msra.mxu1 %v4084_v52 }
 0x502   : > { %1909 = vmatprep.subr.mxu0 %v4089_v53  ;;  %1980 = vmatprep.subr.mxu1 %v4096_v54 }
 0x503   : > { %1910 = vmatpush1.msra.mxu0 %v4101_v55  ;;  %1981 = vmatpush1.msra.mxu1 %v4106_v56 }
 0x504   : > { %1911 = vmatprep.subr.mxu0 %v3815_v8  ;;  %1982 = vmatprep.subr.mxu1 %v4113_v57  ;;  %v4840_v8 = vld [vmem:[#allocation11_spill] sm:$0xff] }
 0x505   : > { %1912 = vmatpush1.msra.mxu0 %v3820_v9  ;;  %1983 = vmatpush1.msra.mxu1 %v4120_v58  ;;  %v4841_v9 = vld [vmem:[#allocation12_spill] sm:$0xff] }
 0x506   : > { %1913 = vmatprep.subr.mxu0 %v3825_v10  ;;  %1984 = vmatprep.subr.mxu1 %v4127_v61  ;;  %v4842_v10 = vld [vmem:[#allocation20_spill] sm:$0xff] }
 0x507   : > { %1914 = vmatpush1.msra.mxu0 %v3831_v11  ;;  %1985 = vmatpush1.msra.mxu1 %v4134_v1  ;;  %v4844_v11 = vld [vmem:[#allocation26_spill] sm:$0xff] }
 0x508   : > { %1915 = vmatprep.subr.mxu0 %v3837_v12  ;;  %1986 = vmatprep.subr.mxu1 %v4141_v2  ;;  %v4846_v12 = vld [vmem:[#allocation27_spill] sm:$0xff] }
 0x509   : > { %1916 = vmatpush1.msra.mxu0 %v3843_v13  ;;  %1987 = vmatpush1.msra.mxu1 %v4148_v19  ;;  %v4848_v13 = vld [vmem:[#allocation28_spill] sm:$0xff] }
 0x50a   : > { %1917 = vmatprep.subr.mxu0 %v3849_v14  ;;  %1988 = vmatprep.subr.mxu1 %v4840_v8  ;;  %v4849_v14 = vld [vmem:[#allocation14_spill] sm:$0xff] }
 0x50b   : > { %1918 = vmatpush1.msra.mxu0 %v4841_v9  ;;  %1989 = vmatpush1.msra.mxu1 %v4842_v10  ;;  %v2673_v9 = vld [vmem:[%s3206_s26 + $0xa8] sm:$0xff] }
 0x50c   : > { %1919 = vmatprep.subr.mxu0 %v4843_v38  ;;  %1990 = vmatprep.subr.mxu1 %v4844_v11 }
 0x50d   : > { %1920 = vmatpush1.msra.mxu0 %v4845_v15  ;;  %1991 = vmatpush1.msra.mxu1 %v4846_v12 }
 0x50e   : > { %1921 = vmatprep.subr.mxu0 %v4847_v16  ;;  %1992 = vmatprep.subr.mxu1 %v4848_v13 }
 0x50f   : > { %1922 = vmatpush1.msra.mxu0 %v4849_v14  ;;  %1993 = vmatpush1.msra.mxu1 %v4850_v41 }
 0x510   : > { %1923 = vmatprep.subr.mxu0 %v4851_v60  ;;  %1994 = vmatprep.subr.mxu1 %v4852_v28 }
 0x511   : > { %1924 = vmatpush1.msra.mxu0 %v4853_v36  ;;  %1995 = vmatpush1.msra.mxu1 %v4854_v24 }
 0x512   : > { %1925 = vmatprep.subr.mxu0 %v4855_v37  ;;  %1996 = vmatprep.subr.mxu1 %v4856_v32 }
 0x513   : > { %1926 = vmatpush1.msra.mxu0 %v4857_v17  ;;  %1959 = vmatprep.mubr.f32.mxu0 %v4858_v39  ;;  %v2675_v17 = vld [vmem:[%s3206_s26 + $0xb8] sm:$0xff] }
 0x514   : > { %1997 = vmatpush1.msra.mxu1 %v4859_v18  ;;  %2030 = vmatprep.mubr.f32.mxu1 %v4858_v39 }
 0x515   : > { %2135 = vmatprep.subr.mxu0 %v4860_v25  ;;  %2206 = vmatprep.subr.mxu1 %v4861_v27 }
 0x5b4   : > { %v1721_v21 = vpop.f32.mrf.mxu0  ;;  %v1792_v26 = vpop.f32.mrf.mxu1 }
 0x5b5   : > { %v1797_v38 = vadd.f32 %v2672_v23, %v1721_v21  ;;  %v1799_v15 = vadd.f32 %v2674_v59, %v1792_v26 }
 0x5b6   : > { %v1723_v16 = vpop.f32.mrf.mxu0  ;;  %v1794_v25 = vpop.f32.mrf.mxu1 }
 0x5b7   : > { %v2676_v14 = vmul.f32 -1.442695, %v1797_v38  ;;  %v2678_v60 = vmul.f32 -1.442695, %v1799_v15  ;;  %v1798_v36 = vadd.f32 %v2673_v9, %v1723_v16  ;;  %v1800_v27 = vadd.f32 %v2675_v17, %v1794_v25  ;;  %v2329_v17 = vld [vmem:[%s4658_s4 + $0x68] sm:$0xff]  ;;  %v2328_v25 = vld [vmem:[%s4658_s4 + $0x60] sm:$0xff] }
 0x5b9   : > { %2915 = vpow2.f32 %v2676_v14  ;;  %v2677_v37 = vmul.f32 -1.442695, %v1798_v36  ;;  %v2330_v36 = vld [vmem:[%s4658_s4 + $0x70] sm:$0xff] }
 0x5ba   : > { %2917 = vpow2.f32 %v2678_v60 }
 0x5bb   : > { %2919 = vpow2.f32 %v2677_v37  ;;  %v4866_v37 = vld [vmem:[#allocation30_spill] sm:$0xff] }
 0x5c6   : > { %v2916_v31 = vpop.eup %2915 }
 0x5c7   : > { %v2918_v18 = vpop.eup %2917  ;;  %v1804_v32 = vadd.f32 1.0, %v2916_v31 }
 0x5c8   : > { %v2920_v24 = vpop.eup %2919  ;;  %v1816_v23 = vadd.f32 1.0, %v2918_v18 }
 0x5c9   : > { %2921 = vrcp.f32 %v1804_v32  ;;  %v1810_v28 = vadd.f32 1.0, %v2920_v24 }
 0x5ca   : > { %2923 = vtanh.f32 %v1800_v27  ;;  %v2327_v27 = vld [vmem:[%s4658_s4 + $0x58] sm:$0xff] }
 0x5cb   : > { %2925 = vrcp.f32 %v1810_v28 }
 0x5cc   : > { %2927 = vrcp.f32 %v1816_v23  ;;  %v2326_v23 = vld [vmem:[%s4658_s4 + $0x50] sm:$0xff] }
 0x5d6   : > { %v2922_v59 = vpop.eup %2921 }
 0x5d7   : > { %v2924_v21 = vpop.eup %2923  ;;  %v1820_v9 = vmul.f32 %v2922_v59, %v4311_v40  ;;  %v2325_v59 = vld [vmem:[%s4658_s4 + $0x48] sm:$0xff] }
 0x5d8   : > { %v2926_v26 = vpop.eup %2925 }
 0x5d9   : > { %v1821_v38 = vmul.f32 %v2926_v26, %v2924_v21  ;;  %v2928_v16 = vpop.eup %2927  ;;  %v2324_v21 = vld [vmem:[%s4658_s4 + $0x40] sm:$0xff]  ;;  %v2323_v26 = vld [vmem:[%s4658_s4 + $0x38] sm:$0xff] }
 0x5db   : > { %v4389_v15 = vadd.f32 %v1821_v38, %v1820_v9  ;;  %v2322_v9 = vld [vmem:[%s4658_s4 + $0x30] sm:$0xff]  ;;  %v2321_v38 = vld [vmem:[%s4658_s4 + $0x28] sm:$0xff] }
 0x5dd   : > { %v4392_v14 = vmul.f32 %v2928_v16, %v4389_v15  ;;  %v2319_v16 = vld [vmem:[%s4658_s4 + $0x18] sm:$0xff] }
 0x5df   : > { %1960 = vmatmul.mubr.f32.vlgmr.msra.gmra.mxu0 %v4392_v14  ;;  %2031 = vmatmul.mubr.f32.vlgmr.msra.gmra.mxu1 %v4392_v14 }
 0x5e0   : > { %2136 = vmatpush1.msra.mxu0 %v3937_v35  ;;  %2207 = vmatpush1.msra.mxu1 %v3942_v30  ;;  %v4862_v35 = vld [vmem:[#allocation31_spill] sm:$0xff]  ;;  %v4863_v30 = vld [vmem:[#allocation32_spill] sm:$0xff] }
 0x5e1   : > { %2137 = vmatprep.subr.mxu0 %v3949_v33  ;;  %2208 = vmatprep.subr.mxu1 %v3954_v34  ;;  %v4864_v33 = vld [vmem:[#allocation33_spill] sm:$0xff]  ;;  %v4865_v34 = vld [vmem:[#allocation34_spill] sm:$0xff] }
 0x5e2   : > { %2138 = vmatpush1.msra.mxu0 %v3961_v62  ;;  %2209 = vmatpush1.msra.mxu1 %v3966_v29  ;;  %v2100_v62 = vld [vmem:[%s4657_s3 + $0xe8] sm:$0xff]  ;;  %v2099_v29 = vld [vmem:[%s4657_s3 + $0xe0] sm:$0xff] }
 0x5e3   : > { %2139 = vmatprep.subr.mxu0 %v3973_v63  ;;  %2210 = vmatprep.subr.mxu1 %v3978_v0  ;;  %v2096_v63 = vld [vmem:[%s4657_s3 + $0xc8] sm:$0xff]  ;;  %v2095_v0 = vld [vmem:[%s4657_s3 + $0xc0] sm:$0xff] }
 0x5e4   : > { %2140 = vmatpush1.msra.mxu0 %v3985_v6  ;;  %2211 = vmatpush1.msra.mxu1 %v3990_v20  ;;  %v2092_v6 = vld [vmem:[%s4657_s3 + $0xa8] sm:$0xff]  ;;  %v2091_v20 = vld [vmem:[%s4657_s3 + $0xa0] sm:$0xff] }
 0x5e5   : > { %2141 = vmatprep.subr.mxu0 %v3997_v22  ;;  %2212 = vmatprep.subr.mxu1 %v4002_v3  ;;  %v2088_v22 = vld [vmem:[%s4657_s3 + $0x88] sm:$0xff]  ;;  %v2087_v3 = vld [vmem:[%s4657_s3 + $0x80] sm:$0xff] }
 0x5e6   : > { %2142 = vmatpush1.msra.mxu0 %v4009_v4  ;;  %2213 = vmatpush1.msra.mxu1 %v4014_v5  ;;  %v2084_v4 = vld [vmem:[%s4657_s3 + $0x68] sm:$0xff]  ;;  %v2083_v5 = vld [vmem:[%s4657_s3 + $0x60] sm:$0xff] }
 0x5e7   : > { %2143 = vmatprep.subr.mxu0 %v4021_v7  ;;  %2214 = vmatprep.subr.mxu1 %v4026_v42  ;;  %v2080_v7 = vld [vmem:[%s4657_s3 + $0x48] sm:$0xff]  ;;  %v2079_v42 = vld [vmem:[%s4657_s3 + $0x40] sm:$0xff] }
 0x5e8   : > { %2144 = vmatpush1.msra.mxu0 %v4033_v43  ;;  %2215 = vmatpush1.msra.mxu1 %v4038_v44  ;;  %v2076_v43 = vld [vmem:[%s4657_s3 + $0x28] sm:$0xff]  ;;  %v2075_v44 = vld [vmem:[%s4657_s3 + $0x20] sm:$0xff] }
 0x5e9   : > { %2145 = vmatprep.subr.mxu0 %v4045_v45  ;;  %2216 = vmatprep.subr.mxu1 %v4050_v46  ;;  %v2072_v45 = vld [vmem:[%s4657_s3 + $0x8] sm:$0xff]  ;;  %v2071_v46 = vld [vmem:[%s4657_s3] sm:$0xff] }
 0x5ea   : > { %2146 = vmatpush1.msra.mxu0 %v4055_v47  ;;  %2217 = vmatpush1.msra.mxu1 %v4062_v48  ;;  %v2331_v47 = vld [vmem:[%s4658_s4 + $0x78] sm:$0xff]  ;;  %v2679_v48 = vld [vmem:[%s3206_s26 + $0xc0] sm:$0xff] }
 0x5eb   : > { %2147 = vmatprep.subr.mxu0 %v4067_v49  ;;  %2218 = vmatprep.subr.mxu1 %v4072_v50  ;;  %v2681_v49 = vld [vmem:[%s3206_s26 + $0xd0] sm:$0xff] }
 0x5ec   : > { %2148 = vmatpush1.msra.mxu0 %v4079_v51  ;;  %2219 = vmatpush1.msra.mxu1 %v4084_v52  ;;  %v2680_v52 = vld [vmem:[%s3206_s26 + $0xc8] sm:$0xff] }
 0x5ed   : > { %2149 = vmatprep.subr.mxu0 %v4089_v53  ;;  %2220 = vmatprep.subr.mxu1 %v4096_v54 }
 0x5ee   : > { %2150 = vmatpush1.msra.mxu0 %v4101_v55  ;;  %2221 = vmatpush1.msra.mxu1 %v4106_v56 }
 0x5ef   : > { %2222 = vmatprep.subr.mxu1 %v4113_v57  ;;  %2199 = vmatprep.mubr.f32.mxu0 %v4858_v39 }
 0x5f0   : > { %2223 = vmatpush1.msra.mxu1 %v4120_v58  ;;  %2270 = vmatprep.mubr.f32.mxu1 %v4858_v39 }
 0x5f1   : > { %2224 = vmatprep.subr.mxu1 %v4127_v61  ;;  %2151 = vmatprep.subr.mxu0 %v2100_v62  ;;  %v4868_v62 = vld [vmem:[#allocation17_spill] sm:$0xff] }
 0x5f2   : > { %2225 = vmatpush1.msra.mxu1 %v4134_v1  ;;  %2152 = vmatpush1.msra.mxu0 %v2099_v29  ;;  %v2682_v1 = vld [vmem:[%s3206_s26 + $0xd8] sm:$0xff]  ;;  %v4869_v29 = vld [vmem:[#allocation35_spill] sm:$0xff] }
 0x5f3   : > { %2226 = vmatprep.subr.mxu1 %v4141_v2  ;;  %2153 = vmatprep.subr.mxu0 %v2096_v63  ;;  %v4870_v63 = vld [vmem:[#allocation36_spill] sm:$0xff] }
 0x5f4   : > { %2227 = vmatpush1.msra.mxu1 %v4148_v19  ;;  %2154 = vmatpush1.msra.mxu0 %v2095_v0  ;;  %v2686_v0 = vld [vmem:[%s3206_s26 + $0xe0] sm:$0xff] }
 0x5f5   : > { %2228 = vmatprep.subr.mxu1 %v4840_v8  ;;  %2155 = vmatprep.subr.mxu0 %v2092_v6  ;;  %v2688_v6 = vld [vmem:[%s3206_s26 + $0xf0] sm:$0xff] }
 0x5f6   : > { %2229 = vmatpush1.msra.mxu1 %v4842_v10  ;;  %2156 = vmatpush1.msra.mxu0 %v2091_v20 }
 0x5f7   : > { %2230 = vmatprep.subr.mxu1 %v4844_v11  ;;  %2157 = vmatprep.subr.mxu0 %v2088_v22 }
 0x5f8   : > { %2231 = vmatpush1.msra.mxu1 %v4846_v12  ;;  %2158 = vmatpush1.msra.mxu0 %v2087_v3  ;;  %v2687_v3 = vld [vmem:[%s3206_s26 + $0xe8] sm:$0xff] }
 0x5f9   : > { %2232 = vmatprep.subr.mxu1 %v4848_v13  ;;  %2159 = vmatprep.subr.mxu0 %v2084_v4 }
 0x5fa   : > { %2233 = vmatpush1.msra.mxu1 %v4850_v41  ;;  %2160 = vmatpush1.msra.mxu0 %v2083_v5 }
 0x5fb   : > { %2234 = vmatprep.subr.mxu1 %v4862_v35  ;;  %2161 = vmatprep.subr.mxu0 %v2080_v7  ;;  %v2318_v35 = vld [vmem:[%s4658_s4 + $0x10] sm:$0xff] }
 0x5fc   : > { %2235 = vmatpush1.msra.mxu1 %v4863_v30  ;;  %2162 = vmatpush1.msra.mxu0 %v2079_v42  ;;  %v2317_v30 = vld [vmem:[%s4658_s4 + $0x8] sm:$0xff] }
 0x5fd   : > { %2236 = vmatprep.subr.mxu1 %v4864_v33  ;;  %2163 = vmatprep.subr.mxu0 %v2076_v43  ;;  %v2316_v33 = vld [vmem:[%s4658_s4] sm:$0xff] }
 0x5fe   : > { %2237 = vmatpush1.msra.mxu1 %v4865_v34  ;;  %2164 = vmatpush1.msra.mxu0 %v2075_v44  ;;  %v4867_v34 = vld [vmem:[#allocation21_spill] sm:$0xff] }
 0x5ff   : > { %2165 = vmatprep.subr.mxu0 %v2072_v45 }
 0x600   : > { %2166 = vmatpush1.msra.mxu0 %v2071_v46  ;;  %v2689_v46 = vld [vmem:[%s3206_s26 + $0xf8] sm:$0xff]  ;;  %s3088_s26 = smov [#allocation5]  }
 0x601   : > { %2729 = vmatprep.subr.mxu0 %v2331_v47  ;;  %s2483_s24 = sshll.u32 %s3088_s26, 4  ;;  %s2484_s24 = int_to_ptr.vmem [resolvable:$true] %s2483_s24 }
 0x602   : > { %s2957_s22 = scalar_lea.vmem %s2484_s24, 128  ;;  %p2964_p3 = scmp.lt.s32.totalorder %s2484_s24, %s2484_s24 }
 0x603   : > { %p2958_p13 = scmp.ne.s32.totalorder %s2484_s24, %s2957_s22  ;;  %p2965_p5 = scmp.lt.s32.totalorder %s2957_s22, %s2957_s22 }
 0x605   : > { %p2959_p0 = pnand %p2958_p13, %p3174_p2  ;;  %p2966_p6 = por %p2965_p5, %p2964_p3 }
 0x607   : > { %p2960_p1 = pneg %p2959_p0 }
 0x609   : > { %p2967_p7 = pnand %p2966_p6, %p2960_p1 }
 0x69f   : > { %v1961_v50 = vpop.f32.mrf.mxu0  ;;  %v2032_v51 = vpop.f32.mrf.mxu1 }
 0x6a0   : > { %v2037_v53 = vadd.f32 %v2679_v48, %v1961_v50  ;;  %v2039_v54 = vadd.f32 %v2681_v49, %v2032_v51 }
 0x6a1   : > { %v1963_v55 = vpop.f32.mrf.mxu0  ;;  %v2034_v2 = vpop.f32.mrf.mxu1 }
 0x6a2   : > { %v2683_v56 = vmul.f32 -1.442695, %v2037_v53  ;;  %v2685_v57 = vmul.f32 -1.442695, %v2039_v54  ;;  %v2038_v58 = vadd.f32 %v2680_v52, %v1963_v55  ;;  %v2040_v40 = vadd.f32 %v2682_v1, %v2034_v2  ;;  %v4561_v54 = vld [vmem:[%s4659_s5] ss:$0 sm:$0xff] }
 0x6a4   : > { %2929 = vpow2.f32 %v2683_v56  ;;  %v2684_v61 = vmul.f32 -1.442695, %v2038_v58 }
 0x6a5   : > { %2931 = vpow2.f32 %v2685_v57 }
 0x6a6   : > { %2933 = vpow2.f32 %v2684_v61 }
 0x6b1   : > { %v2930_v19 = vpop.eup %2929 }
 0x6b2   : > { %v2932_v31 = vpop.eup %2931  ;;  %v2044_v8 = vadd.f32 1.0, %v2930_v19 }
 0x6b3   : > { %v2934_v10 = vpop.eup %2933  ;;  %v2056_v12 = vadd.f32 1.0, %v2932_v31 }
 0x6b4   : > { %2935 = vrcp.f32 %v2044_v8  ;;  %v2050_v11 = vadd.f32 1.0, %v2934_v10 }
 0x6b5   : > { %2937 = vtanh.f32 %v2040_v40 }
 0x6b6   : > { %2939 = vrcp.f32 %v2050_v11 }
 0x6b7   : > { %2941 = vrcp.f32 %v2056_v12 }
 0x6c1   : > { %v2936_v13 = vpop.eup %2935 }
 0x6c2   : > { %v2938_v41 = vpop.eup %2937  ;;  %v2060_v24 = vmul.f32 %v2936_v13, %v4389_v15  ;;  %v2320_v15 = vld [vmem:[%s4658_s4 + $0x20] sm:$0xff] }
 0x6c3   : > { %v2940_v28 = vpop.eup %2939 }
 0x6c4   : > { %v2061_v32 = vmul.f32 %v2940_v28, %v2938_v41  ;;  %v2942_v18 = vpop.eup %2941 }
 0x6c6   : > { %v4500_v39 = vadd.f32 %v2061_v32, %v2060_v24 }
 0x6c8   : > { %v2063_v60 = vmul.f32 %v2942_v18, %v4500_v39 }
 0x6ca   : > { %2200 = vmatmul.mubr.f32.vlgmr.msra.gmra.mxu0 %v2063_v60  ;;  %2271 = vmatmul.mubr.f32.vlgmr.msra.gmra.mxu1 %v2063_v60 }
 0x6cb   : > { %2730 = vmatpush3.msra.mxu0 %v2331_v47  ;;  %2761 = vmatprep.mubr.f32.mxu0 %v4866_v37 }
 0x6cc   : > { %2731 = vmatprep.subr.mxu0 %v2330_v36 }
 0x6cd   : > { %2732 = vmatpush3.msra.mxu0 %v2330_v36 }
 0x6ce   : > { %2733 = vmatprep.subr.mxu0 %v2329_v17 }
 0x6cf   : > { %2734 = vmatpush3.msra.mxu0 %v2329_v17 }
 0x6d0   : > { %2735 = vmatprep.subr.mxu0 %v2328_v25 }
 0x6d1   : > { %2736 = vmatpush3.msra.mxu0 %v2328_v25 }
 0x6d2   : > { %2737 = vmatprep.subr.mxu0 %v2327_v27 }
 0x6d3   : > { %2738 = vmatpush3.msra.mxu0 %v2327_v27 }
 0x6d4   : > { %2739 = vmatprep.subr.mxu0 %v2326_v23 }
 0x6d5   : > { %2740 = vmatpush3.msra.mxu0 %v2326_v23 }
 0x6d6   : > { %2741 = vmatprep.subr.mxu0 %v2325_v59 }
 0x6d7   : > { %2742 = vmatpush3.msra.mxu0 %v2325_v59 }
 0x6d8   : > { %2743 = vmatprep.subr.mxu0 %v2324_v21 }
 0x6d9   : > { %2744 = vmatpush3.msra.mxu0 %v2324_v21 }
 0x6da   : > { %2745 = vmatprep.subr.mxu0 %v2323_v26 }
 0x6db   : > { %2746 = vmatpush3.msra.mxu0 %v2323_v26 }
 0x6dc   : > { %2747 = vmatprep.subr.mxu0 %v2322_v9 }
 0x6dd   : > { %2748 = vmatpush3.msra.mxu0 %v2322_v9 }
 0x6de   : > { %2749 = vmatprep.subr.mxu0 %v2321_v38 }
 0x6df   : > { %2750 = vmatpush3.msra.mxu0 %v2321_v38 }
 0x6e0   : > { %2751 = vmatprep.subr.mxu0 %v2320_v15 }
 0x6e1   : > { %2752 = vmatpush3.msra.mxu0 %v2320_v15 }
 0x6e2   : > { %2753 = vmatprep.subr.mxu0 %v2319_v16 }
 0x6e3   : > { %2754 = vmatpush3.msra.mxu0 %v2319_v16 }
 0x6e4   : > { %2755 = vmatprep.subr.mxu0 %v2318_v35 }
 0x6e5   : > { %2756 = vmatpush3.msra.mxu0 %v2318_v35 }
 0x6e6   : > { %2757 = vmatprep.subr.mxu0 %v2317_v30 }
 0x6e7   : > { %2758 = vmatpush3.msra.mxu0 %v2317_v30 }
 0x6e8   : > { %2759 = vmatprep.subr.mxu0 %v2316_v33 }
 0x6e9   : > { %2760 = vmatpush3.msra.mxu0 %v2316_v33 }
 0x6ea   : > { %2762 = vmatmul.mubr.f32.vlgmr.msra.gmra.mxu0 %v4867_v34 }
 0x6eb   : > { %2764 = vmatprep.mubr.f32.mxu0 %v4868_v62 }
 0x6ee   : > { %2765 = vmatmul.mubr.f32.gmra.mxu0 %v4869_v29 }
 0x6ef   : > { %2767 = vmatprep.mubr.f32.mxu0 %v4870_v63 }
 0x6f2   : > { %2768 = vmatmul.mubr.f32.gmra.mxu0 %v4392_v14 }
 0x6f3   : > { %2770 = vmatprep.mubr.f32.mxu0 %v2063_v60 }
 0x78a   : > { %v2201_v20 = vpop.f32.mrf.mxu0  ;;  %v2272_v22 = vpop.f32.mrf.mxu1 }
 0x78b   : > { %v2277_v4 = vadd.f32 %v2686_v0, %v2201_v20  ;;  %v2279_v5 = vadd.f32 %v2688_v6, %v2272_v22 }
 0x78c   : > { %v2203_v7 = vpop.f32.mrf.mxu0  ;;  %v2274_v47 = vpop.f32.mrf.mxu1 }
 0x78d   : > { %v2690_v42 = vmul.f32 -1.442695, %v2277_v4  ;;  %v2692_v43 = vmul.f32 -1.442695, %v2279_v5  ;;  %v2278_v44 = vadd.f32 %v2687_v3, %v2203_v7  ;;  %v2280_v48 = vadd.f32 %v2689_v46, %v2274_v47 }
 0x78f   : > { %2943 = vpow2.f32 %v2690_v42  ;;  %v2691_v45 = vmul.f32 -1.442695, %v2278_v44 }
 0x790   : > { %2945 = vpow2.f32 %v2692_v43 }
 0x791   : > { %2947 = vpow2.f32 %v2691_v45 }
 0x79c   : > { %v2944_v14 = vpop.eup %2943 }
 0x79d   : > { %v2946_v49 = vpop.eup %2945  ;;  %v2284_v50 = vadd.f32 1.0, %v2944_v14 }
 0x79e   : > { %v2948_v51 = vpop.eup %2947  ;;  %v2296_v53 = vadd.f32 1.0, %v2946_v49 }
 0x79f   : > { %2949 = vrcp.f32 %v2284_v50  ;;  %v2290_v52 = vadd.f32 1.0, %v2948_v51 }
 0x7a0   : > { %2951 = vtanh.f32 %v2280_v48 }
 0x7a1   : > { %2953 = vrcp.f32 %v2290_v52 }
 0x7a2   : > { %2955 = vrcp.f32 %v2296_v53 }
 0x7aa   : > { %v2763_v55 = vpop.f32.mrf.mxu0 }
 0x7ab   : > { %v2411_v56 = vadd.f32 %v2763_v55, %v4561_v54 }
 0x7ac   : > { %v2950_v57 = vpop.eup %2949  ;;  %v2405_v58 = vpop.f32.mrf.mxu0 }
 0x7ad   : > { %v2952_v61 = vpop.eup %2951  ;;  %2445 = vst [vmem:[%s3208_s11 + $0x8] sm:$0xff] %v2411_v56  ;;  %v2406_v1 = vadd.f32 %v4561_v54, %v2405_v58  ;;  %v2300_v31 = vmul.f32 %v2950_v57, %v4500_v39 }
 0x7ae   : > { %v2954_v2 = vpop.eup %2953  ;;  %v2766_v19 = vpop.f32.mrf.mxu0 }
 0x7af   : > { %2444 = vst [vmem:[%s3208_s11] sm:$0xff] %v2406_v1  ;;  %v2421_v40 = vadd.f32 %v2766_v19, %v4561_v54  ;;  %v2301_v8 = vmul.f32 %v2954_v2, %v2952_v61  ;;  %v2956_v13 = vpop.eup %2955 }
 0x7b0   : > { %v2415_v10 = vpop.f32.mrf.mxu0 }
 0x7b1   : > { %2447 = vst [vmem:[%s3208_s11 + $0x18] sm:$0xff] %v2421_v40  ;;  %v2416_v11 = vadd.f32 %v4561_v54, %v2415_v10  ;;  %v2302_v12 = vadd.f32 %v2301_v8, %v2300_v31 }
 0x7b2   : > { %v2769_v41 = vpop.f32.mrf.mxu0 }
 0x7b3   : > { %2446 = vst [vmem:[%s3208_s11 + $0x10] sm:$0xff] %v2416_v11  ;;  %v2431_v28 = vadd.f32 %v2769_v41, %v4561_v54  ;;  %v2303_v24 = vmul.f32 %v2956_v13, %v2302_v12  ;;  %2307 = vst [vmem:[#allocation7] sm:$0xff] %v2302_v12 }
 0x7b4   : > { %v2425_v32 = vpop.f32.mrf.mxu0 }
 0x7b5   : > { %2449 = vst [vmem:[%s3208_s11 + $0x28] sm:$0xff] %v2431_v28  ;;  %v2426_v18 = vadd.f32 %v4561_v54, %v2425_v32  ;;  %2771 = vmatmul.mubr.f32.gmra.mxu0 %v2303_v24  ;;  %2306 = vst [vmem:[#allocation5] sm:$0xff] %v2303_v24 }
 0x7b7   : > { %2448 = vst [vmem:[%s3208_s11 + $0x20] sm:$0xff] %v2426_v18 }
 0x7b8   : > { %2970 = shalt.err (!%p2967_p7)
}
 0x7b9   : > { %2775 = dma.vmem_to_hbm [thread:$0]  (%p3174_p2), %s2484_s24, 128, %s4661_s7, [#allocation6]  }
 0x7ba   : > { %s3089_s25 = smov [#allocation7]  }
 0x7bb   : > { %s2496_s12 = sshll.u32 %s3089_s25, 4  ;;  %s2497_s12 = int_to_ptr.vmem [resolvable:$true] %s2496_s12 }
 0x7bc   : > { %s2981_s13 = scalar_lea.vmem %s2497_s12, 128  ;;  %p2988_p12 = scmp.lt.s32.totalorder %s2497_s12, %s2497_s12 }
 0x7bd   : > { %p2982_p9 = scmp.ne.s32.totalorder %s2497_s12, %s2981_s13  ;;  %p2989_p13 = scmp.lt.s32.totalorder %s2981_s13, %s2981_s13 }
 0x7bf   : > { %p2983_p10 = pnand %p2982_p9, %p3174_p2  ;;  %p2990_p0 = por %p2989_p13, %p2988_p12 }
 0x7c1   : > { %p2984_p11 = pneg %p2983_p10 }
 0x7c3   : > { %p2991_p1 = pnand %p2990_p0, %p2984_p11 }
 0x7c5   : > { %2994 = shalt.err (!%p2991_p1)
}
 0x7c6   : > { %2777 = dma.vmem_to_hbm [thread:$0]  (%p3174_p2), %s2497_s12, 128, %s4662_s8, [#allocation6]  }
 0x7c7   : > { %s2704_s21 = sshll.u32 %s3077_s30, 10  ;;  %s2467_s26 = sshll.u32 %s3208_s11, 4  ;;  %s4600_s26 = int_to_ptr.vmem [resolvable:$true] %s2467_s26 }
 0x7c8   : > { %s4596_s20 = scalar_lea.hbm %s4660_s6, %s2704_s21  ;;  %s4871_s30 = sand.u32 1, %s3069_s28  }
 0x7c9   : > { %s4605_s23 = scalar_lea.sflag [#allocation4], %s4871_s30  ;;  %s3005_s25 = scalar_lea.vmem %s4600_s26, 1024 }
 0x7ca   : > { %p3006_p3 = scmp.ne.s32.totalorder %s4600_s26, %s3005_s25  ;;  %s3090_s12 = smov [#allocation3]  }
 0x7cb   : > { %s3009_s13 = sshll.u32 %s3090_s12, 4  ;;  %s3010_s13 = int_to_ptr.vmem [resolvable:$false] %s3009_s13 }
 0x7cc   : > { %p3007_p5 = pnand %p3006_p3, %p3184_p4  ;;  %s3011_s14 = scalar_lea.vmem %s3010_s13, 2048 }
 0x7cd   : > { %p3012_p7 = scmp.lt.s32.totalorder %s4600_s26, %s3010_s13  ;;  %p3013_p9 = scmp.lt.s32.totalorder %s3011_s14, %s3005_s25 }
 0x7ce   : > { %p3008_p6 = pneg %p3007_p5 }
 0x7cf   : > { %p3014_p10 = por %p3013_p9, %p3012_p7 }
 0x7d1   : > { %p3015_p11 = pnand %p3014_p10, %p3008_p6 }
 0x875   : > { %v2772_v39 = vpop.f32.mrf.mxu0 }
 0x876   : > { %v2441_v60 = vadd.f32 %v2772_v39, %v4561_v54 }
 0x877   : > { %v2435_v36 = vpop.f32.mrf.mxu0 }
 0x878   : > { %2451 = vst [vmem:[%s3208_s11 + $0x38] sm:$0xff] %v2441_v60  ;;  %v2436_v37 = vadd.f32 %v4561_v54, %v2435_v36 }
 0x87a   : > { %2450 = vst [vmem:[%s3208_s11 + $0x30] sm:$0xff] %v2436_v37 }
 0x87b   : > { %3018 = shalt.err (!%p3015_p11)
}
 0x87c   : > { %s3019_s11 = scalar_lea.hbm %s4596_s20, 1024  ;;  %s3023_s24 = scalar_lea.hbm %s4660_s6, 2048 }
 0x87d   : > { %p3020_p12 = scmp.ne.s32.totalorder %s4596_s20, %s3019_s11  ;;  %p3024_p1 = scmp.lt.s32.totalorder %s4596_s20, %s4660_s6 }
 0x87e   : > { %p3025_p3 = scmp.lt.s32.totalorder %s3023_s24, %s3019_s11 }
 0x87f   : > { %p3021_p13 = pnand %p3020_p12, %p3184_p4 }
 0x880   : > { %p3026_p5 = por %p3025_p3, %p3024_p1 }
 0x881   : > { %p3022_p0 = pneg %p3021_p13 }
 0x883   : > { %p3027_p6 = pnand %p3026_p5, %p3022_p0 }
 0x885   : > { %3030 = shalt.err (!%p3027_p6)
}
 0x886   : > { %s3091_s25 = smov 128   ;;  %s3092_s12 = smov 8  }
 0x887   : > { %2773 = dma.vmem_to_hbm [thread:$0]  (%p3184_p4), %s4600_s26, 1024, %s4596_s20, %s4605_s23, %s3091_s25, %s3091_s25, %s3092_s12  }
 0x888   : > { %3056 = dma.done.wait (%p3174_p2), [#allocation6], 256  }
 0x889   : > { %3058 = vsyncadd (%p3174_p2), [#allocation6], 4294967040 }
 0x88a PF: > { %p2791_p7 = scmp.ge.s32.totalorder %s3085_s10, 2  ;;  %s2516_s13 = sand.u32 1, %s3065_s27  }
 0x88b   : > { %s2517_s14 = scalar_lea.sflag [#allocation4], %s2516_s13 }
 0x88c   : > { %p2784_p9 = pnand %p2791_p7, %p3191_p8 }
 0x88e   : > { %p2785_p10 = pneg %p2784_p9 }
 0x890   : > { %3060 = dma.done.wait (%p2785_p10), %s2517_s14, 1024  }
 0x891   : > { %3062 = vsyncadd (%p2785_p10), %s2517_s14, 4294966272  ;;  %s23_s10 = sadd.s32 1, %s3085_s10   ;;  %s4872_s15 = sld [smem:[#allocation10_spill]] }
 0x892   : > { %p20_p4 = scmp.ge.s32.totalorder %s23_s10, 4   ;;  %s4873_s27 = smov %s3069_s28 }
 0x893   : > { %s4874_s28 = smov %s3073_s29  ;;  %s4875_s29 = smov %s3197_s19 }
 0x894   : > { %s4876_s30 = smov %s3081_s9  ;;  %22 = sbr.rel (!%p20_p4) target bundleno = 5 (0x5), region = 121 }
 0x897   : > { %s4877_s9 = smov %s4872_s15 }
 0x899   :  { %2522 = vsyncpa [#allocation4], 1 }
 0x89a   :  { %2524 = vsyncpa [#allocation4 + $0x1], 1 }
 0x89b   :  { %2525 = vsyncpa [#allocation6], 1 }

</bundles_post_ra>
